<compile_context>
chip_gen: v7x
topology: tpu7x:2x2x1
jax: 0.10.0
libtpu: 0.0.40
codegen_flags: <defaults>
</compile_context>

<pallas_src>
import functools

import jax
import jax.numpy as jnp
from jax.experimental import pallas as pl
from jax.experimental.pallas import tpu as pltpu


def _ceil_to(x, m):
    return (x + m - 1) // m * m


def _wpad(w):
    """Haloed width for spatial width w (data lives at cols [2, w+2))."""
    wp = w + 4
    if wp % 2:
        wp += 1                       # even -> 2x2-pool pair views stay aligned
    if w >= 48:
        wp = _ceil_to(wp, 8)          # sublane-align flat row starts for big images
    return wp


_VMEM_LIMIT_CACHE = []


def _vmem_limit():
    # Raise the scoped-VMEM limit above the 32 MiB default but stay inside physical
    # VMEM (128 MiB v5e/v6e, 64 MiB per core on v7x).
    if not _VMEM_LIMIT_CACHE:
        try:
            cap = pltpu.get_tpu_info().vmem_capacity_bytes
            _VMEM_LIMIT_CACHE.append(int(min(cap * 0.85, 110 * 1024 * 1024)))
        except Exception:
            _VMEM_LIMIT_CACHE.append(48 * 1024 * 1024)
    return _VMEM_LIMIT_CACHE[0]


# ---------------------------------------------------------------------------
# haloed-layout helpers (XLA side; reshapes of contiguous arrays are free)
# ---------------------------------------------------------------------------

def to_haloed(x_nhwc, wp):
    """NHWC -> haloed flat bf16 (N, (H+4)*wp, Cp) with data at rows/cols offset 2."""
    n, h, w, c = x_nhwc.shape
    cp = 8 if c < 8 else c                                 # guard tiny-K first conv
    xp = jnp.pad(x_nhwc.astype(jnp.bfloat16),
                 ((0, 0), (2, 2), (2, wp - 2 - w), (0, cp - c)))
    return xp.reshape(n, (h + 4) * wp, cp)


def from_haloed_nchw(x_hal, hh, ww, c):
    """Haloed flat bf16 -> NCHW f32 feature (slice + transpose fuse in XLA)."""
    n, L, _ = x_hal.shape
    hp = hh + 4
    wp = L // hp
    x4 = x_hal.reshape(n, hp, wp, c)
    return jnp.transpose(x4[:, 2:hh + 2, 2:ww + 2, :], (0, 3, 1, 2)).astype(jnp.float32)


# ---------------------------------------------------------------------------
# Fused 3x3 conv + bias + ReLU (haloed in -> haloed out, bf16 MXU, f32 acc)
# ---------------------------------------------------------------------------

def _conv3x3_kernel(x_ref, w_ref, b_ref, o_ref, *scratch,
                    hh, ww, wp, th, cin, merge, relu):
    # x_ref: (1, (hh+4)*wp, cin) bf16  haloed input of one batch element
    # w_ref: (9*cin, tn)         bf16  taps stacked along K in (kh, kw, ci) order
    # b_ref: (1, tn)             f32
    # o_ref: (1, (hh+4)*wp, tn)  bf16  haloed output (halo zeros written here)
    tn = o_ref.shape[-1]
    patch_ref = scratch[0] if merge else None
    bias = b_ref[...]                                       # (1, tn) f32, read once

    # halo rows/cols the chunk stores below never touch -> zero them explicitly
    o_ref[0, 0:2 * wp + 2, :] = jnp.zeros((2 * wp + 2, tn), o_ref.dtype)
    o_ref[0, (hh + 2) * wp + 2:(hh + 4) * wp, :] = (
        jnp.zeros((2 * wp - 2, tn), o_ref.dtype))

    def compute_chunk(h0, hs):                              # h0 may be traced, hs static
        m = hs * wp
        if merge:
            # in-VMEM im2col: one (m, 9*cin) patch -> a single K = 9*cin MXU matmul
            for kh in range(3):
                for kw in range(3):
                    t = kh * 3 + kw
                    start = (h0 + kh + 1) * wp + kw + 1
                    patch_ref[0:m, t * cin:(t + 1) * cin] = (
                        x_ref[0, pl.ds(start, m), :])
            acc = jnp.dot(patch_ref[0:m, :], w_ref[...],
                          preferred_element_type=jnp.float32)
        else:
            # wide-K layers: chained per-tap dots; m kept small so the f32 accumulator
            # stays vreg-resident (no per-tap VMEM round trip of the accumulator)
            acc = None
            for kh in range(3):
                for kw in range(3):
                    t = kh * 3 + kw
                    start = (h0 + kh + 1) * wp + kw + 1
                    d = jnp.dot(x_ref[0, pl.ds(start, m), :],
                                w_ref[t * cin:(t + 1) * cin, :],
                                preferred_element_type=jnp.float32)
                    acc = d if acc is None else acc + d
        acc = acc + bias
        if relu:
            acc = jnp.maximum(acc, 0.0)
        # flat columns >= ww of each output row are junk; their store targets are
        # exactly halo positions of the output layout -> force them to zero
        col = jax.lax.broadcasted_iota(jnp.int32, (m, 1), 0) % wp
        acc = jnp.where(col < ww, acc, 0.0)
        o_ref[0, pl.ds((h0 + 2) * wp + 2, m), :] = acc.astype(o_ref.dtype)

    nfull, rem = divmod(hh, th)
    if 0 < nfull <= 8:
        for i in range(nfull):                  # short trip counts: static unroll
            compute_chunk(i * th, th)
    elif nfull > 8:
        def body(i, carry):                     # long trip counts: bounded live ranges
            compute_chunk(i * th, th)
            return carry
        jax.lax.fori_loop(0, nfull, body, 0)
    if rem:
        compute_chunk(nfull * th, rem)


def conv3x3_relu(x_hal, w9, b, *, hh, ww, wp, relu=True, tile_cout=256):
    """3x3 conv, stride 1, pad 1 (PyTorch Conv2d semantics) on haloed activations."""
    n, L, cin = x_hal.shape
    cout = w9.shape[-1]
    hp = hh + 4
    assert L == hp * wp and w9.shape[0] == 9 * cin

    tn = min(cout, tile_cout)          # NOTE: 128 may be preferable on v5e (4x128^2 MXU)
    assert cout % tn == 0
    merge = cin <= 128                 # fold all 9 taps into one K = 9*cin matmul
    m_target = 512 if merge else 128   # per-tap path: keep the f32 acc in vregs
    th = max(1, min(hh, m_target // wp))

    # weight-stationary grid order for layers where weights outweigh the activation
    w_bytes = 9 * cin * cout * 2
    act_bytes = L * cin * 2
    batch_inner = w_bytes > act_bytes
    if batch_inner:
        grid = (cout // tn, n)
        x_map, w_map = (lambda j, i: (i, 0, 0)), (lambda j, i: (0, j))
        b_map, o_map = (lambda j, i: (0, j)), (lambda j, i: (i, 0, j))
    else:
        grid = (n, cout // tn)
        x_map, w_map = (lambda i, j: (i, 0, 0)), (lambda i, j: (0, j))
        b_map, o_map = (lambda i, j: (0, j)), (lambda i, j: (i, 0, j))

    scratch = [pltpu.VMEM((th * wp, 9 * cin), jnp.bfloat16)] if merge else []

    weight_reads = 1 if batch_inner else n
    act_reads = cout // tn if batch_inner else 1
    cost = pl.CostEstimate(
        flops=int(2 * n * hh * ww * 9 * cin * cout),
        transcendentals=0,
        bytes_accessed=int(act_reads * n * L * cin * 2
                           + weight_reads * 9 * cin * cout * 2
                           + n * L * cout * 2))

    return pl.pallas_call(
        functools.partial(_conv3x3_kernel, hh=hh, ww=ww, wp=wp, th=th,
                          cin=cin, merge=merge, relu=relu),
        out_shape=jax.ShapeDtypeStruct((n, hp * wp, cout), jnp.bfloat16),
        grid_spec=pltpu.PrefetchScalarGridSpec(
            num_scalar_prefetch=0,
            grid=grid,
            in_specs=[
                pl.BlockSpec((1, hp * wp, cin), x_map),
                pl.BlockSpec((9 * cin, tn), w_map),
                pl.BlockSpec((1, tn), b_map),
            ],
            out_specs=pl.BlockSpec((1, hp * wp, tn), o_map),
            scratch_shapes=scratch,
        ),
        compiler_params=pltpu.CompilerParams(
            dimension_semantics=("parallel", "parallel"),
            vmem_limit_bytes=_vmem_limit()),
        cost_estimate=cost,
    )(x_hal, w9, b.reshape(1, cout).astype(jnp.float32))


# ---------------------------------------------------------------------------
# MaxPool2d(2, 2): haloed in -> haloed out, whole image per grid step
# ---------------------------------------------------------------------------

def _maxpool_kernel(x_ref, o_ref, *, ho, wo, wpo, c, row_tile):
    # x_ref: (1, HP/2, 2, WP/2, 2c) haloed input viewed as row/column pairs
    # o_ref: (1, ho+4, wpo, c)      haloed output
    zeros = functools.partial(jnp.zeros, dtype=o_ref.dtype)
    o_ref[0, 0:2, :, :] = zeros((2, wpo, c))
    o_ref[0, ho + 2:ho + 4, :, :] = zeros((2, wpo, c))
    o_ref[0, 2:ho + 2, 0:2, :] = zeros((ho, 2, c))
    o_ref[0, 2:ho + 2, wo + 2:wpo, :] = zeros((ho, wpo - wo - 2, c))
    for r0 in range(0, ho, row_tile):
        rs = min(row_tile, ho - r0)
        a = x_ref[0, 1 + r0:1 + r0 + rs, 0, 1:wo + 1, :]    # (rs, wo, 2c)
        b = x_ref[0, 1 + r0:1 + r0 + rs, 1, 1:wo + 1, :]
        m = jnp.maximum(a, b)                               # max over the H pair
        o_ref[0, 2 + r0:2 + r0 + rs, 2:wo + 2, :] = (
            jnp.maximum(m[..., :c], m[..., c:]))            # max over the W pair


def maxpool2x2(x_hal, *, hh, ww, wp, c):
    n = x_hal.shape[0]
    hp = hh + 4
    ho, wo = hh // 2, ww // 2
    hpo, wpo = ho + 4, _wpad(wo)
    xv = x_hal.reshape(n, hp // 2, 2, wp // 2, 2 * c)       # free contiguous view
    row_tile = max(1, min(ho, 8))
    out = pl.pallas_call(
        functools.partial(_maxpool_kernel, ho=ho, wo=wo, wpo=wpo, c=c,
                          row_tile=row_tile),
        out_shape=jax.ShapeDtypeStruct((n, hpo, wpo, c), jnp.bfloat16),
        grid_spec=pltpu.PrefetchScalarGridSpec(
            num_scalar_prefetch=0,
            grid=(n,),
            in_specs=[pl.BlockSpec((1, hp // 2, 2, wp // 2, 2 * c),
                                   lambda i: (i, 0, 0, 0, 0))],
            out_specs=pl.BlockSpec((1, hpo, wpo, c), lambda i: (i, 0, 0, 0)),
        ),
        compiler_params=pltpu.CompilerParams(
            dimension_semantics=("parallel",),
            vmem_limit_bytes=_vmem_limit()),
        cost_estimate=pl.CostEstimate(
            flops=int(3 * n * ho * wo * c), transcendentals=0,
            bytes_accessed=int(n * (hp * wp + hpo * wpo) * c * 2)),
    )(xv)
    return out.reshape(n, hpo * wpo, c)


# ---------------------------------------------------------------------------
# Gram matrix straight from the bf16 haloed activation (halo zeros contribute 0)
# ---------------------------------------------------------------------------

def _gram_kernel(f_ref, o_ref, acc_ref, *, scale):
    @pl.when(pl.program_id(1) == 0)
    def _():
        acc_ref[...] = jnp.zeros_like(acc_ref)

    f = f_ref[0]                                            # (tl, c) bf16
    acc_ref[...] += jax.lax.dot_general(
        f, f, (((0,), (0,)), ((), ())), preferred_element_type=jnp.float32)

    @pl.when(pl.program_id(1) == pl.num_programs(1) - 1)
    def _():
        o_ref[0] = acc_ref[...] * scale


def gram_matrix(x_hal, *, hh, ww):
    # TODO(synk): gram_matrix() is not defined in the reference snippet; the standard
    #             F @ F^T / (C*H*W) perceptual-loss form is used.
    n, L, c = x_hal.shape
    scale = 1.0 / float(c * hh * ww)
    if L > 2048:
        tl = 1024
        Lp = _ceil_to(L, tl)
        if Lp != L:                                         # zero pad contributes nothing
            x_hal = jnp.pad(x_hal, ((0, 0), (0, Lp - L), (0, 0)))
        L = Lp
    else:
        tl = L
    return pl.pallas_call(
        functools.partial(_gram_kernel, scale=scale),
        out_shape=jax.ShapeDtypeStruct((n, c, c), jnp.float32),
        grid_spec=pltpu.PrefetchScalarGridSpec(
            num_scalar_prefetch=0,
            grid=(n, L // tl),
            in_specs=[pl.BlockSpec((1, tl, c), lambda i, l: (i, l, 0))],
            out_specs=pl.BlockSpec((1, c, c), lambda i, l: (i, 0, 0)),
            scratch_shapes=[pltpu.VMEM((c, c), jnp.float32)],
        ),
        compiler_params=pltpu.CompilerParams(
            dimension_semantics=("parallel", "arbitrary"),
            vmem_limit_bytes=_vmem_limit()),
        cost_estimate=pl.CostEstimate(
            flops=int(2 * n * L * c * c), transcendentals=0,
            bytes_accessed=int(n * (L * c * 2 + c * c * 4))),
    )(x_hal)


# ---------------------------------------------------------------------------
# VGG19 features (torchvision layers 0..35) on top of the Pallas kernels
# ---------------------------------------------------------------------------

# slices split after layers 8/17/26/35 (relu2_2 / relu3_4 / relu4_4 / relu5_4)
VGG19_CFG = [
    ("conv", 3, 64), ("conv", 64, 64), ("pool",),
    ("conv", 64, 128), ("conv", 128, 128), ("out",),
    ("pool",), ("conv", 128, 256), ("conv", 256, 256),
    ("conv", 256, 256), ("conv", 256, 256), ("out",),
    ("pool",), ("conv", 256, 512), ("conv", 512, 512),
    ("conv", 512, 512), ("conv", 512, 512), ("out",),
    ("pool",), ("conv", 512, 512), ("conv", 512, 512),
    ("conv", 512, 512), ("conv", 512, 512), ("out",),
]


def init_params(key):
    # TODO(synk): pretrained torchvision weights replaced by deterministic He init.
    params = []
    for op in VGG19_CFG:
        if op[0] == "conv":
            _, cin, cout = op
            key, k1, k2 = jax.random.split(key, 3)
            w = (jax.random.normal(k1, (3, 3, cin, cout), jnp.float32)
                 * jnp.sqrt(2.0 / (9.0 * cin)))
            cin_p = 8 if cin < 8 else cin
            if cin_p != cin:
                w = jnp.pad(w, ((0, 0), (0, 0), (0, cin_p - cin), (0, 0)))
            w9 = w.reshape(9 * cin_p, cout).astype(jnp.bfloat16)   # taps stacked along K
            b = jax.random.normal(k2, (cout,), jnp.float32) * 0.01
            params.append((w9, b))
        else:
            params.append(None)
    return params


def vgg19_forward(params, x_nchw, mode):
    """Mirrors Vgg19.forward(X, mode) with mode in {'feature', 'embedding'}."""
    _, _, hh, ww = x_nchw.shape
    wp = _wpad(ww)
    h = to_haloed(jnp.transpose(x_nchw, (0, 2, 3, 1)), wp)
    c = h.shape[-1]
    taps = []                               # (haloed act, h, w, c) at slice boundaries
    for op, p in zip(VGG19_CFG, params):
        if op[0] == "conv":
            h = conv3x3_relu(h, p[0], p[1], hh=hh, ww=ww, wp=wp)   # every VGG conv relu'd
            c = op[2]
        elif op[0] == "pool":
            h = maxpool2x2(h, hh=hh, ww=ww, wp=wp, c=c)
            hh, ww = hh // 2, ww // 2
            wp = _wpad(ww)
        else:  # "out": record slice-boundary feature
            taps.append((h, hh, ww, c))
    feature_x = [from_haloed_nchw(t, a, b, cc) for (t, a, b, cc) in taps]
    if mode == "feature":
        return tuple(feature_x)
    elif mode == "embedding":
        feature_gx = [gram_matrix(t, hh=a, ww=b) for (t, a, b, cc) in taps]
        return (feature_x, feature_gx)
    else:
        raise ValueError


if __name__ == "__main__":
    key = jax.random.PRNGKey(0)
    kx, kp, kc = jax.random.split(key, 3)

    # ---- kernel unit checks against pure-JAX references (small shapes) ----
    for cin, cout in ((64, 128), (256, 256)):          # merged-tap and per-tap paths
        kc, k1, k2, k3 = jax.random.split(kc, 4)
        hh = ww = 8
        x = jax.random.normal(k1, (2, hh, ww, cin), jnp.float32).astype(jnp.bfloat16)
        w = (jax.random.normal(k2, (3, 3, cin, cout), jnp.float32)
             * jnp.sqrt(2.0 / (9.0 * cin))).astype(jnp.bfloat16)
        b = jax.random.normal(k3, (cout,), jnp.float32) * 0.1
        wp = _wpad(ww)
        y = conv3x3_relu(to_haloed(x, wp), w.reshape(9 * cin, cout), b,
                         hh=hh, ww=ww, wp=wp)
        y_nchw = from_haloed_nchw(y, hh, ww, cout)
        ref = jax.lax.conv_general_dilated(
            x.astype(jnp.float32), w.astype(jnp.float32), (1, 1), ((1, 1), (1, 1)),
            dimension_numbers=("NHWC", "HWIO", "NHWC"))
        ref = jnp.transpose(jnp.maximum(ref + b, 0.0), (0, 3, 1, 2))
        assert bool(jnp.allclose(y_nchw, ref, atol=5e-2, rtol=5e-2)), f"conv cin={cin}"

    kc, k1 = jax.random.split(kc)
    hh = ww = 8
    c = 64
    x = jax.random.normal(k1, (2, hh, ww, c), jnp.float32).astype(jnp.bfloat16)
    wp = _wpad(ww)
    xh = to_haloed(x, wp)
    yp = from_haloed_nchw(maxpool2x2(xh, hh=hh, ww=ww, wp=wp, c=c), hh // 2, ww // 2, c)
    pref = jnp.transpose(
        jnp.max(x.astype(jnp.float32).reshape(2, hh // 2, 2, ww // 2, 2, c),
                axis=(2, 4)), (0, 3, 1, 2))
    assert bool(jnp.allclose(yp, pref, atol=1e-6)), "maxpool"

    g = gram_matrix(xh, hh=hh, ww=ww)
    f = x.astype(jnp.float32).reshape(2, hh * ww, c)
    gref = jnp.einsum("nlc,nld->ncd", f, f) / float(c * hh * ww)
    assert bool(jnp.allclose(g, gref, atol=1e-3, rtol=1e-2)), "gram"

    # ---- full forward (exercises every kernel via 'embedding' mode) ----
    x = jax.random.normal(kx, (2, 3, 32, 32), jnp.float32)
    params = init_params(kp)
    fwd = jax.jit(vgg19_forward, static_argnames="mode")
    feature_x, feature_gx = jax.block_until_ready(fwd(params, x, mode="embedding"))

    assert feature_x[0].shape == (2, 128, 16, 16)   # relu2_2
    assert feature_x[1].shape == (2, 256, 8, 8)     # relu3_4
    assert feature_x[2].shape == (2, 512, 4, 4)     # relu4_4
    assert feature_x[3].shape == (2, 512, 2, 2)     # relu5_4
    assert feature_gx[0].shape == (2, 128, 128)
    assert feature_gx[3].shape == (2, 512, 512)
    assert all(bool(jnp.isfinite(f).all()) for f in feature_x)
    assert all(bool(jnp.isfinite(g).all()) for g in feature_gx)

    feats_only = jax.block_until_ready(fwd(params, x, mode="feature"))
    assert len(feats_only) == 4 and feats_only[0].shape == (2, 128, 16, 16)
    print("KERNEL_OK")
</pallas_src>

<mosaic_0001>
module attributes {stable_mosaic.version = 11 : i64} {
  func.func @_conv3x3_kernel(%arg0: i32, %arg1: i32, %arg2: memref<1x144x64xbf16, #tpu.memory_space<vmem>>, %arg3: memref<576x128xbf16, #tpu.memory_space<vmem>>, %arg4: memref<1x128xf32, #tpu.memory_space<vmem>>, %arg5: memref<1x144x128xbf16, #tpu.memory_space<vmem>>, %arg6: memref<96x576xbf16, #tpu.memory_space<vmem>>) attributes {dimension_semantics = [#tpu.dimension_semantics<parallel>, #tpu.dimension_semantics<parallel>], iteration_bounds = array<i64: 1, 2>, scalar_prefetch = 0 : i64, scratch_operands = 1 : i64, tpu.core_type = #tpu.core_type<tc>, window_params = [{transform_indices = @transform_0, window_bounds = array<i64: 1, 144, 64>}, {transform_indices = @transform_1, window_bounds = array<i64: 576, 128>}, {transform_indices = @transform_2, window_bounds = array<i64: 1, 128>}, {transform_indices = @transform_3, window_bounds = array<i64: 1, 144, 128>}]} {
    %c0 = arith.constant 0 : index
    %c0_0 = arith.constant 0 : index
    %0 = vector.load %arg4[%c0, %c0_0] : memref<1x128xf32, #tpu.memory_space<vmem>>, vector<1x128xf32>
    %cst = arith.constant 0.000000e+00 : bf16
    %1 = vector.broadcast %cst : bf16 to vector<26x128xbf16>
    %c0_1 = arith.constant 0 : index
    %c0_2 = arith.constant 0 : index
    %c0_3 = arith.constant 0 : index
    %2 = vector.load %arg5[%c0_1, %c0_2, %c0_3] : memref<1x144x128xbf16, #tpu.memory_space<vmem>>, vector<1x26x128xbf16>
    %3 = vector.shape_cast %2 : vector<1x26x128xbf16> to vector<26x128xbf16>
    %4 = vector.shape_cast %1 : vector<26x128xbf16> to vector<1x26x128xbf16>
    tpu.vector_store %arg5[%c0_1, %c0_2, %c0_3], %4 {strides = array<i32>} : memref<1x144x128xbf16, #tpu.memory_space<vmem>>, vector<1x26x128xbf16>,
    %cst_4 = arith.constant 0.000000e+00 : bf16
    %5 = vector.broadcast %cst_4 : bf16 to vector<22x128xbf16>
    %c0_5 = arith.constant 0 : index
    %c122 = arith.constant 122 : index
    %c0_6 = arith.constant 0 : index
    %6 = vector.load %arg5[%c0_5, %c122, %c0_6] : memref<1x144x128xbf16, #tpu.memory_space<vmem>>, vector<1x22x128xbf16>
    %7 = vector.shape_cast %6 : vector<1x22x128xbf16> to vector<22x128xbf16>
    %8 = vector.shape_cast %5 : vector<22x128xbf16> to vector<1x22x128xbf16>
    tpu.vector_store %arg5[%c0_5, %c122, %c0_6], %8 {strides = array<i32>} : memref<1x144x128xbf16, #tpu.memory_space<vmem>>, vector<1x22x128xbf16>,
    %c0_7 = arith.constant 0 : index
    %c13 = arith.constant 13 : index
    %c0_8 = arith.constant 0 : index
    %9 = vector.load %arg2[%c0_7, %c13, %c0_8] : memref<1x144x64xbf16, #tpu.memory_space<vmem>>, vector<1x96x64xbf16>
    %10 = vector.shape_cast %9 : vector<1x96x64xbf16> to vector<96x64xbf16>
    %c0_9 = arith.constant 0 : index
    %c0_10 = arith.constant 0 : index
    %11 = vector.load %arg6[%c0_9, %c0_10] : memref<96x576xbf16, #tpu.memory_space<vmem>>, vector<96x64xbf16>
    tpu.vector_store %arg6[%c0_9, %c0_10], %10 {strides = array<i32>} : memref<96x576xbf16, #tpu.memory_space<vmem>>, vector<96x64xbf16>,
    %c0_11 = arith.constant 0 : index
    %c14 = arith.constant 14 : index
    %c0_12 = arith.constant 0 : index
    %12 = vector.load %arg2[%c0_11, %c14, %c0_12] : memref<1x144x64xbf16, #tpu.memory_space<vmem>>, vector<1x96x64xbf16>
    %13 = vector.shape_cast %12 : vector<1x96x64xbf16> to vector<96x64xbf16>
    %c0_13 = arith.constant 0 : index
    %c64 = arith.constant 64 : index
    %14 = vector.load %arg6[%c0_13, %c64] : memref<96x576xbf16, #tpu.memory_space<vmem>>, vector<96x64xbf16>
    tpu.vector_store %arg6[%c0_13, %c64], %13 {strides = array<i32>} : memref<96x576xbf16, #tpu.memory_space<vmem>>, vector<96x64xbf16>,
    %c0_14 = arith.constant 0 : index
    %c15 = arith.constant 15 : index
    %c0_15 = arith.constant 0 : index
    %15 = vector.load %arg2[%c0_14, %c15, %c0_15] : memref<1x144x64xbf16, #tpu.memory_space<vmem>>, vector<1x96x64xbf16>
    %16 = vector.shape_cast %15 : vector<1x96x64xbf16> to vector<96x64xbf16>
    %c0_16 = arith.constant 0 : index
    %c128 = arith.constant 128 : index
    %17 = vector.load %arg6[%c0_16, %c128] : memref<96x576xbf16, #tpu.memory_space<vmem>>, vector<96x64xbf16>
    tpu.vector_store %arg6[%c0_16, %c128], %16 {strides = array<i32>} : memref<96x576xbf16, #tpu.memory_space<vmem>>, vector<96x64xbf16>,
    %c0_17 = arith.constant 0 : index
    %c25 = arith.constant 25 : index
    %c0_18 = arith.constant 0 : index
    %18 = vector.load %arg2[%c0_17, %c25, %c0_18] : memref<1x144x64xbf16, #tpu.memory_space<vmem>>, vector<1x96x64xbf16>
    %19 = vector.shape_cast %18 : vector<1x96x64xbf16> to vector<96x64xbf16>
    %c0_19 = arith.constant 0 : index
    %c192 = arith.constant 192 : index
    %20 = vector.load %arg6[%c0_19, %c192] : memref<96x576xbf16, #tpu.memory_space<vmem>>, vector<96x64xbf16>
    tpu.vector_store %arg6[%c0_19, %c192], %19 {strides = array<i32>} : memref<96x576xbf16, #tpu.memory_space<vmem>>, vector<96x64xbf16>,
    %c0_20 = arith.constant 0 : index
    %c26 = arith.constant 26 : index
    %c0_21 = arith.constant 0 : index
    %21 = vector.load %arg2[%c0_20, %c26, %c0_21] : memref<1x144x64xbf16, #tpu.memory_space<vmem>>, vector<1x96x64xbf16>
    %22 = vector.shape_cast %21 : vector<1x96x64xbf16> to vector<96x64xbf16>
    %c0_22 = arith.constant 0 : index
    %c256 = arith.constant 256 : index
    %23 = vector.load %arg6[%c0_22, %c256] : memref<96x576xbf16, #tpu.memory_space<vmem>>, vector<96x64xbf16>
    tpu.vector_store %arg6[%c0_22, %c256], %22 {strides = array<i32>} : memref<96x576xbf16, #tpu.memory_space<vmem>>, vector<96x64xbf16>,
    %c0_23 = arith.constant 0 : index
    %c27 = arith.constant 27 : index
    %c0_24 = arith.constant 0 : index
    %24 = vector.load %arg2[%c0_23, %c27, %c0_24] : memref<1x144x64xbf16, #tpu.memory_space<vmem>>, vector<1x96x64xbf16>
    %25 = vector.shape_cast %24 : vector<1x96x64xbf16> to vector<96x64xbf16>
    %c0_25 = arith.constant 0 : index
    %c320 = arith.constant 320 : index
    %26 = vector.load %arg6[%c0_25, %c320] : memref<96x576xbf16, #tpu.memory_space<vmem>>, vector<96x64xbf16>
    tpu.vector_store %arg6[%c0_25, %c320], %25 {strides = array<i32>} : memref<96x576xbf16, #tpu.memory_space<vmem>>, vector<96x64xbf16>,
    %c0_26 = arith.constant 0 : index
    %c37 = arith.constant 37 : index
    %c0_27 = arith.constant 0 : index
    %27 = vector.load %arg2[%c0_26, %c37, %c0_27] : memref<1x144x64xbf16, #tpu.memory_space<vmem>>, vector<1x96x64xbf16>
    %28 = vector.shape_cast %27 : vector<1x96x64xbf16> to vector<96x64xbf16>
    %c0_28 = arith.constant 0 : index
    %c384 = arith.constant 384 : index
    %29 = vector.load %arg6[%c0_28, %c384] : memref<96x576xbf16, #tpu.memory_space<vmem>>, vector<96x64xbf16>
    tpu.vector_store %arg6[%c0_28, %c384], %28 {strides = array<i32>} : memref<96x576xbf16, #tpu.memory_space<vmem>>, vector<96x64xbf16>,
    %c0_29 = arith.constant 0 : index
    %c38 = arith.constant 38 : index
    %c0_30 = arith.constant 0 : index
    %30 = vector.load %arg2[%c0_29, %c38, %c0_30] : memref<1x144x64xbf16, #tpu.memory_space<vmem>>, vector<1x96x64xbf16>
    %31 = vector.shape_cast %30 : vector<1x96x64xbf16> to vector<96x64xbf16>
    %c0_31 = arith.constant 0 : index
    %c448 = arith.constant 448 : index
    %32 = vector.load %arg6[%c0_31, %c448] : memref<96x576xbf16, #tpu.memory_space<vmem>>, vector<96x64xbf16>
    tpu.vector_store %arg6[%c0_31, %c448], %31 {strides = array<i32>} : memref<96x576xbf16, #tpu.memory_space<vmem>>, vector<96x64xbf16>,
    %c0_32 = arith.constant 0 : index
    %c39 = arith.constant 39 : index
    %c0_33 = arith.constant 0 : index
    %33 = vector.load %arg2[%c0_32, %c39, %c0_33] : memref<1x144x64xbf16, #tpu.memory_space<vmem>>, vector<1x96x64xbf16>
    %34 = vector.shape_cast %33 : vector<1x96x64xbf16> to vector<96x64xbf16>
    %c0_34 = arith.constant 0 : index
    %c512 = arith.constant 512 : index
    %35 = vector.load %arg6[%c0_34, %c512] : memref<96x576xbf16, #tpu.memory_space<vmem>>, vector<96x64xbf16>
    tpu.vector_store %arg6[%c0_34, %c512], %34 {strides = array<i32>} : memref<96x576xbf16, #tpu.memory_space<vmem>>, vector<96x64xbf16>,
    %c0_35 = arith.constant 0 : index
    %c0_36 = arith.constant 0 : index
    %36 = vector.load %arg6[%c0_35, %c0_36] : memref<96x576xbf16, #tpu.memory_space<vmem>>, vector<96x576xbf16>
    %c0_37 = arith.constant 0 : index
    %c0_38 = arith.constant 0 : index
    %37 = vector.load %arg3[%c0_37, %c0_38] : memref<576x128xbf16, #tpu.memory_space<vmem>>, vector<576x128xbf16>
    %cst_39 = arith.constant dense<0.000000e+00> : vector<96x128xf32>
    %38 = tpu.matmul %36, %37, %cst_39 {dimension_numbers = #tpu.dot_dimension_numbers<[1], [0], [0], [1], [0, 0, 1, 1], [], []>} : vector<96x576xbf16>, vector<576x128xbf16>, vector<96x128xf32> -> vector<96x128xf32>
    %39 = vector.broadcast %0 : vector<1x128xf32> to vector<96x128xf32>
    %40 = arith.addf %38, %39 : vector<96x128xf32>
    %cst_40 = arith.constant 0.000000e+00 : f32
    %41 = vector.broadcast %cst_40 : f32 to vector<96x128xf32>
    %42 = arith.maximumf %40, %41 : vector<96x128xf32>
    %43 = tpu.iota {dimensions = array<i32: 0>} : vector<96x1xi32>
    %c12_i32 = arith.constant 12 : i32
    %c0_i32 = arith.constant 0 : i32
    %44 = arith.cmpi eq, %c12_i32, %c0_i32 : i32
    %c1_i32 = arith.constant 1 : i32
    %45 = arith.select %44, %c1_i32, %c12_i32 : i32
    %46 = vector.broadcast %45 : i32 to vector<96x1xi32>
    %47 = arith.remsi %43, %46 : vector<96x1xi32>
    %c0_i32_41 = arith.constant 0 : i32
    %48 = vector.broadcast %c0_i32_41 : i32 to vector<96x1xi32>
    %49 = arith.cmpi ne, %47, %48 : vector<96x1xi32>
    %c0_i32_42 = arith.constant 0 : i32
    %50 = vector.broadcast %c0_i32_42 : i32 to vector<96x1xi32>
    %51 = arith.cmpi slt, %47, %50 : vector<96x1xi32>
    %c0_i32_43 = arith.constant 0 : i32
    %52 = arith.cmpi slt, %45, %c0_i32_43 : i32
    %53 = vector.broadcast %52 : i1 to vector<96x1xi1>
    %54 = vector.broadcast %53 : vector<96x1xi1> to vector<96x1xi1>
    %55 = arith.xori %51, %54 : vector<96x1xi1>
    %56 = arith.andi %55, %49 : vector<96x1xi1>
    %57 = vector.broadcast %45 : i32 to vector<96x1xi32>
    %58 = arith.addi %47, %57 : vector<96x1xi32>
    %59 = arith.select %56, %58, %47 : vector<96x1xi1>, vector<96x1xi32>
    %c8_i32 = arith.constant 8 : i32
    %60 = vector.broadcast %c8_i32 : i32 to vector<96x1xi32>
    %61 = arith.cmpi slt, %59, %60 : vector<96x1xi32>
    %cst_44 = arith.constant 0.000000e+00 : f32
    %62 = vector.shape_cast %61 : vector<96x1xi1> to vector<96x1xi1>
    %63 = vector.broadcast %62 : vector<96x1xi1> to vector<96x128xi1>
    %64 = vector.broadcast %cst_44 : f32 to vector<96x128xf32>
    %65 = arith.select %63, %42, %64 : vector<96x128xi1>, vector<96x128xf32>
    %66 = arith.truncf %65 : vector<96x128xf32> to vector<96x128xbf16>
    %c0_45 = arith.constant 0 : index
    %c26_46 = arith.constant 26 : index
    %c0_47 = arith.constant 0 : index
    %67 = vector.load %arg5[%c0_45, %c26_46, %c0_47] : memref<1x144x128xbf16, #tpu.memory_space<vmem>>, vector<1x96x128xbf16>
    %68 = vector.shape_cast %67 : vector<1x96x128xbf16> to vector<96x128xbf16>
    %69 = vector.shape_cast %66 : vector<96x128xbf16> to vector<1x96x128xbf16>
    tpu.vector_store %arg5[%c0_45, %c26_46, %c0_47], %69 {strides = array<i32>} : memref<1x144x128xbf16, #tpu.memory_space<vmem>>, vector<1x96x128xbf16>,
    return
  }
  func.func @transform_0(%arg0: i32, %arg1: i32) -> (i32, i32, i32) {
    %c0_i32 = arith.constant 0 : i32
    %c0_i32_0 = arith.constant 0 : i32
    %c0_i32_1 = arith.constant 0 : i32
    return %arg1, %c0_i32, %c0_i32_0 : i32, i32, i32
  }
  func.func @transform_1(%arg0: i32, %arg1: i32) -> (i32, i32) {
    %c0_i32 = arith.constant 0 : i32
    %c0_i32_0 = arith.constant 0 : i32
    return %c0_i32, %arg0 : i32, i32
  }
  func.func @transform_2(%arg0: i32, %arg1: i32) -> (i32, i32) {
    %c0_i32 = arith.constant 0 : i32
    %c0_i32_0 = arith.constant 0 : i32
    return %c0_i32, %arg0 : i32, i32
  }
  func.func @transform_3(%arg0: i32, %arg1: i32) -> (i32, i32, i32) {
    %c0_i32 = arith.constant 0 : i32
    %c0_i32_0 = arith.constant 0 : i32
    return %arg1, %c0_i32, %arg0 : i32, i32, i32
  }
}

</mosaic_0001>

<bundles_post_ra>
// kernel: tpu_custom_call.1
= control target key start
LH: loop header
LB: loop body
LE: loop exit
PB: predicated region body
PF: predicated region fallthrough
CT: control target
= control target key end

     0   :  { %8 = vsyncpa [#allocation4], 0  ;;  %s3772_s0 = inlined_call_operand.vmem [shape: bf16[2,144,64], index: 0, kind: input, shape index: {}]   ;;  %s3773_s1 = inlined_call_operand.hbm [shape: bf16[576,128], index: 1, kind: input, shape index: {}]   ;;  %s3774_s2 = inlined_call_operand.vmem [shape: f32[1,128], index: 2, kind: input, shape index: {}]   ;;  %s3775_s3 = inlined_call_operand.hbm [shape: bf16[2,144,128], index: 3, kind: output, shape index: {}]  }
   0x1   :  { %9 = vsyncpa [#allocation5], 0 }
   0x2   :  { %11 = vsyncpa [#allocation5 + $0x1], 0  ;;  %s2890_s12 = smov 0   ;;  %s2892_s13 = smov 0  }
   0x3   :  { %s2894_s14 = smov 0   ;;  %s2896_s15 = smov 0  }
   0x4   :  { %s2898_s16 = smov 0   ;;  %s2900_s17 = smov 0  }
   0x5 LB: > { %s2270_s18 = sadd.s32 4294967295, %s2861_s17   ;;  %s2271_s19 = sadd.s32 4294967294, %s2861_s17   ;;  %s2861_s17 = sphi %s2900_s17, %s17_s17   ;;  %s2857_s16 = sphi %s2898_s16, %s3843_s16   ;;  %s2853_s15 = sphi %s2896_s15, %s3842_s15   ;;  %s2849_s14 = sphi %s2894_s14, %s3841_s14   ;;  %s2845_s13 = sphi %s2892_s13, %s3840_s13   ;;  %s2841_s12 = sphi %s2890_s12, %s3839_s12  }
   0x6   : > { %s26_s20 = sadd.s32 1, %s2857_s16  ;;  %s116_s21 = sadd.s32 1, %s2849_s14 }
   0x7   : > { %p27_p0 = scmp.ge.s32.totalorder %s26_s20, 2  ;;  %p126_p1 = scmp.ne.s32.totalorder %s2849_s14, %s2845_s13 }
   0x8   : > { %p127_p2 = scmp.eq.s32.totalorder %s2270_s18, 1  ;;  %p132_p3 = scmp.ne.s32.totalorder %s2845_s13, %s2841_s12 }
   0x9   : > { %s3845_s20 = smov (%p27_p0, %s26_s20), 0  ;;  %p133_p5 = scmp.eq.s32.totalorder %s2271_s19, 1 }
   0xa   : > { %p2930_p4 = por %p127_p2, %p126_p1  ;;  %s111_s23 = ssub.s32 %s2857_s16, %s3845_s20 }
   0xb   : > { %p2272_p6 = scmp.ge.s32.totalorder %s2861_s17, 1  ;;  %p114_p7 = scmp.eq.s32.totalorder %s111_s23, 0 }
   0xc   : > { %s3780_s22 = scalar_select %p2930_p4, 1, 0 }
   0xd   : > { %p2937_p8 = por %p133_p5, %p132_p3  ;;  %p140_p9 = scmp.lt.s32.totalorder %s2861_s17, 3 }
   0xe   : > { %s2943_s25 = scalar_select %p114_p7, %s2849_s14, %s116_s21  }
   0xf   : > { %s3781_s24 = scalar_select %p2937_p8, 1, 0 }
  0x10   : > { %p2945_p10 = pnand %p2272_p6, %p140_p9  ;;  %p2949_p11 = scmp.eq.s32.totalorder %s2270_s18, 0 }
  0x11   : > { %s2863_s28 = smov [#allocation3]   ;;  %s2751_s6 = scalar_lea.hbm %s3773_s1, 4608 }
  0x12   : > { %s3782_s26 = scalar_select %p2945_p10, 1, 0 }
  0x13   : > { %s3783_s27 = scalar_select %p2949_p11, 1, 0 }
  0x14   : > { %p2587_p12 = pneg %p2945_p10  ;;  %s154_s29 = sshll.u32 %s2863_s28, 4  ;;  %s155_s29 = int_to_ptr.vmem [resolvable:$true] %s154_s29 }
  0x15   : > { %p2752_p0 = scmp.ne.s32.totalorder %s3773_s1, %s2751_s6  ;;  %p2758_p5 = scmp.lt.u32.totalorder %s2751_s6, %s3773_s1 }
  0x16   : > { %p2957_p13 = pnand %p2949_p11, %p2587_p12 }
  0x18   : > { %p2753_p1 = pneg %p2957_p13 }
  0x1a   : > { %p2754_p2 = pnand %p2753_p1, %p2752_p0 }
  0x1c   : > { %p2755_p3 = pneg %p2754_p2 }
  0x1e   : > { %p2760_p6 = pnand %p2758_p5, %p2755_p3 }
  0x20   : > { %2763 = shalt.err (!%p2760_p6)
}
  0x21   : > { %s2764_s11 = scalar_lea.vmem %s155_s29, 4608  ;;  %p2772_p8 = scmp.lt.s32.totalorder %s155_s29, %s155_s29 }
  0x22   : > { %p2765_p7 = scmp.ne.s32.totalorder %s155_s29, %s2764_s11  ;;  %p2773_p4 = scmp.lt.s32.totalorder %s2764_s11, %s2764_s11 }
  0x24   : > { %p2767_p9 = pnand %p2765_p7, %p2753_p1  ;;  %p2774_p11 = por %p2773_p4, %p2772_p8 }
  0x26   : > { %p2768_p12 = pneg %p2767_p9 }
  0x28   : > { %p2775_p10 = pnand %p2774_p11, %p2768_p12 }
  0x2a   : > { %2778 = shalt.err (!%p2775_p10)
}
  0x2b   : > { %s2864_s18 = smov 64   ;;  %s2865_s19 = smov 4  }
  0x2c   : > { %2590 = dma.hbm_to_vmem [thread:$0]  (!%p2957_p13), %s3773_s1, 4608, %s155_s29, [#allocation4], %s2864_s18, %s2864_s18, %s2865_s19  }
  0x2d   : > { %p3785_p0 = scmp.ne.s32.totalorder %s3782_s26, 0 }
  0x2e   : > { %p3786_p2 = scmp.ne.s32.totalorder (!%p3785_p0), %s3783_s27, 0 }
  0x2f   : > { %184 = sbr.rel (%p3785_p0) target bundleno = 497 (0x1f1), region = 32 }
  0x36   : > { %2832 = dma.done.wait (%p3786_p2), [#allocation4], 4608  }
  0x37   : > { %2834 = vsyncadd (%p3786_p2), [#allocation4], 4294962688  ;;  %p211_p4 = scmp.lt.s32.totalorder %s2853_s15, 1  ;;  %vm396_vm0 = vcmask 1044480   ;;  %vm797_vm1 = vsmask.f32 6400 }
  0x38   : > { %vm602_vm2 = vsmask.f32 7424  ;;  %s2866_s26 = smov 64   ;;  %vm274_vm3 = vsmask.f32 5376  ;;  %vm343_vm4 = vcmask 523264  }
  0x39   : > { %s212_s28 = scalar_select %p211_p4, %s2853_s15, 1  ;;  %vm725_vm5 = vcmask 1046528   ;;  %vm481_vm6 = vsmask.f32 4352  ;;  %vm428_vm7 = vcmask 1048064  }
  0x3a   : > { %s208_s27 = sand.u32 1, %s2845_s13   ;;  %s2580_s10 = smul.u32 1152, %s2853_s15 }
  0x3b   : > { %s2555_s4 = smul.u32 72, %s212_s28  ;;  %s3724_s21 = scalar_lea.sflag [#allocation5], %s208_s27 }
  0x3c   : > { %s2554_s29 = smul.u32 72, %s208_s27  ;;  %s3714_s19 = scalar_lea.hbm %s3775_s3, %s2580_s10 }
  0x3d   : > { %s2988_s6 = scalar_lea.vmem %s3772_s0, %s2555_s4  ;;  %p3837_p10 = scmp.ne.s32.totalorder %s3780_s22, 0 }
  0x3e   : > { %v2652_v0 = vld [vmem:[%s2988_s6 + $0x10] sm:$0xf8]   ;;  %v2653_v1 = vld [vmem:[%s2988_s6 + $0x18] sm:$0xff]   ;;  %v2993_v2 = vld [vmem:[%s2988_s6 + $0x20] sm:$0xff]   ;;  %s3234_s7 = scalar_lea.vmem [#allocation6], %s2554_s29  ;;  %s2868_s28 = smov [#allocation6]  }
  0x3f   : > { %v1050_v3 = vrot.slane %v2652_v0, 3  ;;  %v1051_v4 = vrot.slane %v2653_v1, 3  ;;  %v1053_v5 = vrot.slane %v2993_v2, 3  ;;  %v2656_v6 = vld [vmem:[%s2988_s6 + $0x14] sm:$0xff]   ;;  %v2655_v8 = vld [vmem:[%s2988_s6 + $0xc] sm:$0xfe]  }
  0x40   : > { %v807_v10 = vshrl.u32 %v2656_v6, 16  ;;  %v810_v11 = vshll.u32 %v2656_v6, 16  ;;  %v799_v12 = vshrl.u32 %v2655_v8, 16  ;;  %v802_v13 = vshll.u32 %v2655_v8, 16  ;;  %v2657_v14 = vld [vmem:[%s2988_s6 + $0xc] sm:$0xff]   ;;  %v2658_v15 = vld [vmem:[%s2988_s6 + $0x14] sm:$0xff]  }
  0x41   : > { %v1052_v7 = vsel %vm396_vm0, %v1050_v3, %v1051_v4  ;;  %v1054_v9 = vsel %vm396_vm0, %v1051_v4, %v1053_v5  ;;  %v604_v20 = vshrl.u32 %v2657_v14, 16  ;;  %v606_v21 = vshll.u32 %v2657_v14, 16  ;;  %v2659_v24 = vld [vmem:[%s2988_s6 + $0x4] sm:$0xf8]   ;;  %v2660_v25 = vld [vmem:[%s2988_s6 + $0xc] sm:$0xff]   ;;  %v2661_v28 = vld [vmem:[%s2988_s6 + $0x1c] sm:$0xff]  }
  0x42   : > { %1063 = vrot.lane.b32.xlu0 %v1052_v7, %s2866_s26  ;;  %1065 = vrot.lane.b32.xlu1 %v1054_v9, %s2866_s26  ;;  %v809_v16 = vrot.slane %v807_v10, 1  ;;  %v812_v17 = vrot.slane %v810_v11, 2  ;;  %v801_v18 = vrot.slane %v799_v12, 1  ;;  %v804_v19 = vrot.slane %v802_v13, 2  ;;  %v2662_v32 = vld [vmem:[%s2988_s6 + $0x1c] sm:$0xff]   ;;  %v2663_v39 = vld [vmem:[%s2988_s6 + $0x28] sm:$0xff]  }
  0x43   : > { %v611_v23 = vshll.u32 %v2658_v15, 16  ;;  %v608_v27 = vrot.slane %v606_v21, 1  ;;  %v397_v30 = vrot.slane %v2659_v24, 3  ;;  %v398_v31 = vrot.slane %v2660_v25, 3  ;;  %v2664_v40 = vld [vmem:[%s2988_s6 + $0x14] sm:$0xff]   ;;  %v2665_v48 = vld [vmem:[%s2988_s6 + $0x24] sm:$0xff]  }
  0x44   : > { %v813_v22 = vor.u32 %v812_v17, %v809_v16  ;;  %v805_v26 = vor.u32 %v804_v19, %v801_v18  ;;  %v816_v35 = vshrl.u32 %v2661_v28, 16  ;;  %v819_v36 = vshll.u32 %v2661_v28, 16  ;;  %v2666_v51 = vld [vmem:[%s2988_s6 + $0x24] sm:$0xff]   ;;  %v3024_v59 = vld [vmem:[%s2988_s6 + $0x30] sm:$0xff]   ;;  %v2668_v8 = vld [vmem:[%s2988_s6 + $0x1c] sm:$0xff]   ;;  %s2172_s11 = sshll.u32 %s3234_s7, 4  ;;  %s3717_s11 = int_to_ptr.vmem [resolvable:$true] %s2172_s11 }
  0x45   : > { %v613_v29 = vrot.slane %v611_v23, 1  ;;  %v609_v34 = vor.u32 %v608_v27, %v604_v20  ;;  %v615_v37 = vshrl.u32 %v2658_v15, 16  ;;  %v619_v38 = vshll.u32 %v2662_v32, 16  ;;  %v2669_v60 = vld [vmem:[%s2988_s6 + $0x2c] sm:$0xff]   ;;  %v2673_v11 = vld [vmem:[%s2988_s6 + $0x34] sm:$0xff]   ;;  %v3045_v17 = vld [vmem:[%s2988_s6 + $0x24] sm:$0xff]  }
  0x46   : > { %v814_v33 = vsel %vm797_vm1, %v805_v26, %v813_v22  ;;  %v399_v42 = vsel %vm396_vm0, %v397_v30, %v398_v31  ;;  %v818_v43 = vrot.slane %v816_v35, 1  ;;  %v821_v44 = vrot.slane %v819_v36, 2  ;;  %v2670_v1 = vld [vmem:[%s2988_s6 + $0x2c] sm:$0xff]   ;;  %v3042_v16 = vld [vmem:[%s2988_s6 + $0x38] sm:$0xff]   ;;  %v2680_v23 = vld [vmem:[#allocation3 + $0xc0] sm:$0xff]   ;;  %s2779_s23 = scalar_lea.vmem %s3717_s11, 1152 }
  0x47   : > { %860 = vrot.lane.b32.xlu0 %v814_v33, %s2866_s26  ;;  %v614_v41 = vsel %vm602_vm2, %v609_v34, %v613_v29  ;;  %v617_v45 = vor.u32 %v615_v37, %v613_v29  ;;  %v621_v46 = vrot.slane %v619_v38, 1  ;;  %v1055_v47 = vrot.slane %v2663_v39, 3  ;;  %v3051_v25 = vld [vmem:[%s2988_s6 + $0x34] sm:$0xff]   ;;  %v3055_v28 = vld [vmem:[%s2988_s6 + $0x2c] sm:$0xff]   ;;  %2464 = vmatprep.subr.bf16.mxu1 %v2680_v23  ;;  %v2681_v36 = vld [vmem:[#allocation3 + $0x80] sm:$0xff]   ;;  %p2780_p8 = scmp.ne.s32.totalorder %s3717_s11, %s2779_s23  ;;  %s2783_s4 = sshll.u32 %s2868_s28, 4  ;;  %s2784_s4 = int_to_ptr.vmem [resolvable:$false] %s2783_s4 }
  0x48   : > { %655 = vrot.lane.b32.xlu1 %v614_v41, %s2866_s26  ;;  %v822_v49 = vor.u32 %v821_v44, %v818_v43  ;;  %v400_v50 = vrot.slane %v2664_v40, 3  ;;  %v825_v52 = vshrl.u32 %v2665_v48, 16  ;;  %v623_v53 = vshrl.u32 %v2662_v32, 16  ;;  %v2677_v29 = vld [vmem:[%s2988_s6 + $0x3c] ss:$0 sps:$4 sm:$0x33]   ;;  %2465 = vmatpush3.bf16.msra.mxu1 %v2681_v36  ;;  %p2786_p1 = scmp.lt.s32.totalorder %s3717_s11, %s2784_s4 }
  0x49   : > { %v622_v55 = vsel %vm602_vm2, %v617_v45, %v621_v46  ;;  %v828_v56 = vshll.u32 %v2665_v48, 16  ;;  %v627_v57 = vshll.u32 %v2666_v51, 16  ;;  %v1056_v61 = vsel %vm396_vm0, %v1053_v5, %v1055_v47  ;;  %v2682_v38 = vld [vmem:[#allocation3 + $0xc8] sm:$0xff]   ;;  %v2683_v43 = vld [vmem:[#allocation3 + $0x40] sm:$0xff]   ;;  %v2705_v36 = vld [vmem:[#allocation3 + $0xf0] sm:$0xff]   ;;  %p2781_p11 = pnand %p2780_p8, %p3837_p10  ;;  %s2785_s5 = scalar_lea.vmem %s2784_s4, 2304 }
  0x4a   : > { %v823_v54 = vsel %vm797_vm1, %v813_v22, %v822_v49  ;;  %v827_v58 = vrot.slane %v825_v52, 1  ;;  %v834_v63 = vshrl.u32 %v2669_v60, 16  ;;  %v837_v0 = vshll.u32 %v2669_v60, 16  ;;  %v2675_v22 = vld [vmem:[%s2988_s6 + $0x40] ss:$0 sps:$4 sm:$0x77]   ;;  %2466 = vmatprep.subr.bf16.mxu1 %v2682_v38  ;;  %2412 = vmatprep.subr.bf16.mxu0 %v2683_v43  ;;  %p2787_p3 = scmp.lt.s32.totalorder %s2785_s5, %s2779_s23 }
  0x4b   : > { %410 = vrot.lane.b32.xlu0 %v399_v42, %s2866_s26  ;;  %v830_v62 = vrot.slane %v828_v56, 2  ;;  %v401_v3 = vsel %vm396_vm0, %v398_v31, %v400_v50  ;;  %v625_v6 = vor.u32 %v623_v53, %v621_v46  ;;  %v629_v7 = vrot.slane %v627_v57, 1  ;;  %v2684_v45 = vld [vmem:[#allocation3 + $0x88] sm:$0xff]   ;;  %v2678_v48 = vld [vmem:[%s2988_s6 + $0x3c] ss:$0 sps:$4 sm:$0x11]   ;;  %p2782_p13 = pneg %p2781_p11 }
  0x4c   : > { %862 = vrot.lane.b32.xlu1 %v823_v54, %s2866_s26  ;;  %v1057_v2 = vrot.slane %v3024_v59, 3  ;;  %v836_v5 = vrot.slane %v834_v63, 1  ;;  %v839_v10 = vrot.slane %v837_v0, 2  ;;  %v635_v12 = vshll.u32 %v2670_v1, 16  ;;  %2467 = vmatpush3.bf16.msra.mxu1 %v2684_v45  ;;  %v2685_v52 = vld [vmem:[#allocation3] sm:$0xff]   ;;  %v2686_v54 = vld [vmem:[#allocation3 + $0xd0] sm:$0xff]   ;;  %p2788_p5 = por %p2787_p3, %p2786_p1 }
  0x4d   : > { %v831_v4 = vor.u32 %v830_v62, %v827_v58  ;;  %v630_v13 = vsel %vm602_vm2, %v625_v6, %v629_v7  ;;  %v402_v14 = vrot.slane %v2668_v8, 3  ;;  %v631_v15 = vshrl.u32 %v2666_v51, 16  ;;  %2413 = vmatpush3.bf16.msra.mxu0 %v2685_v52  ;;  %v2687_v57 = vld [vmem:[#allocation3 + $0x48] sm:$0xff]   ;;  %2468 = vmatprep.subr.bf16.mxu1 %v2686_v54  ;;  %v2688_v59 = vld [vmem:[#allocation3 + $0x90] sm:$0xff]   ;;  %v2690_v0 = vld [vmem:[#allocation3 + $0xd8] sm:$0xff]  }
  0x4e   : > { %v843_v18 = vshrl.u32 %v2673_v11, 16  ;;  %v846_v19 = vshll.u32 %v2673_v11, 16  ;;  %v1058_v20 = vsel %vm396_vm0, %v1055_v47, %v1057_v2  ;;  %v840_v21 = vor.u32 %v839_v10, %v836_v5  ;;  %v2679_v62 = vld [vmem:[%s2988_s6 + $0x34] ss:$0 sps:$4 sm:$0x77]   ;;  %2414 = vmatprep.subr.bf16.mxu0 %v2687_v57  ;;  %v2689_v63 = vld [vmem:[#allocation3 + $0x8] sm:$0xff]   ;;  %p2789_p6 = pnand %p2788_p5, %p2782_p13 }
  0x4f   : > { %657 = vrot.lane.b32.xlu0 %v622_v55, %s2866_s26  ;;  %v832_v9 = vsel %vm797_vm1, %v822_v49, %v831_v4  ;;  %v637_v24 = vrot.slane %v635_v12, 1  ;;  %v403_v26 = vsel %vm396_vm0, %v400_v50, %v402_v14  ;;  %v633_v27 = vor.u32 %v631_v15, %v629_v7  ;;  %v2692_v6 = vld [vmem:[#allocation3 + $0x98] sm:$0xff]   ;;  %v2693_v5 = vld [vmem:[#allocation3 + $0x10] sm:$0xff]   ;;  %v2708_v43 = vld [vmem:[#allocation3 + $0x68] sm:$0xff]  }
  0x50   : > { %1067 = vrot.lane.b32.xlu1 %v1056_v61, %s2866_s26  ;;  %v1059_v30 = vrot.slane %v3042_v16, 3  ;;  %v404_v31 = vrot.slane %v3045_v17, 3  ;;  %v841_v32 = vsel %vm797_vm1, %v831_v4, %v840_v21  ;;  %v845_v33 = vrot.slane %v843_v18, 1  ;;  %2469 = vmatpush3.bf16.msra.mxu1 %v2688_v59  ;;  %v2691_v4 = vld [vmem:[#allocation3 + $0x50] sm:$0xff]   ;;  %v2695_v12 = vld [vmem:[#allocation3 + $0x58] sm:$0xff]   ;;  %v2698_v16 = vld [vmem:[#allocation3 + $0xe8] sm:$0xff]  }
  0x51   : > { %v848_v34 = vrot.slane %v846_v19, 2  ;;  %v639_v35 = vshrl.u32 %v2670_v1, 16  ;;  %v643_v37 = vshll.u32 %v3051_v25, 16  ;;  %v638_v39 = vsel %vm602_vm2, %v633_v27, %v637_v24  ;;  %2415 = vmatpush3.bf16.msra.mxu0 %v2689_v63  ;;  %2470 = vmatprep.subr.bf16.mxu1 %v2690_v0  ;;  %v2697_v15 = vld [vmem:[#allocation3 + $0x18] sm:$0xff]   ;;  %v2699_v18 = vld [vmem:[%s2988_s6 + $0x10] sm:$0xfc]  }
  0x52   : > { %v1061_v40 = vrot.slane %v2675_v22, 3  ;;  %v406_v41 = vrot.slane %v3055_v28, 3  ;;  %v852_v42 = vshrl.u32 %v2677_v29, 16  ;;  %v855_v44 = vshll.u32 %v2677_v29, 16  ;;  %2416 = vmatprep.subr.bf16.mxu0 %v2691_v4  ;;  %v2700_v19 = vld [vmem:[%s2988_s6 + $0x18] sm:$0xff]  }
  0x53   : > { %412 = vrot.lane.b32.xlu0 %v401_v3, %s2866_s26  ;;  %v1060_v46 = vsel %vm396_vm0, %v1057_v2, %v1059_v30  ;;  %v849_v47 = vor.u32 %v848_v34, %v845_v33  ;;  %v405_v49 = vsel %vm396_vm0, %v402_v14, %v404_v31  ;;  %v641_v50 = vor.u32 %v639_v35, %v637_v24  ;;  %v2713_v54 = vld [vmem:[#allocation3 + $0xf8] sm:$0xff]  }
  0x54   : > { %864 = vrot.lane.b32.xlu1 %v832_v9, %s2866_s26  ;;  %v645_v51 = vrot.slane %v643_v37, 1  ;;  %v854_v53 = vrot.slane %v852_v42, 1  ;;  %v857_v56 = vrot.slane %v855_v44, 2  ;;  %v647_v58 = vshrl.u32 %v3051_v25, 16  ;;  %2471 = vmatpush3.bf16.msra.mxu1 %v2692_v6  ;;  %v2694_v9 = vld [vmem:[#allocation3 + $0xe0] sm:$0xff]   ;;  %v2702_v25 = vld [vmem:[#allocation3 + $0xa8] sm:$0xff]  }
  0x55   : > { %v850_v55 = vsel %vm797_vm1, %v840_v21, %v849_v47  ;;  %v651_v61 = vshll.u32 %v2678_v48, 16  ;;  %v1062_v1 = vsel %vm396_vm0, %v1059_v30, %v1061_v40  ;;  %v407_v7 = vsel %vm396_vm0, %v404_v31, %v406_v41  ;;  %2417 = vmatpush3.bf16.msra.mxu0 %v2693_v5  ;;  %2472 = vmatprep.subr.bf16.mxu1 %v2694_v9  ;;  %v2703_v30 = vld [vmem:[#allocation3 + $0x20] sm:$0xff]   ;;  %v3097_v37 = vld [vmem:[%s2988_s6 + $0x14] sm:$0xff]  }
  0x56   : > { %v646_v60 = vsel %vm602_vm2, %v641_v50, %v645_v51  ;;  %v858_v3 = vor.u32 %v857_v56, %v854_v53  ;;  %v649_v8 = vor.u32 %v647_v58, %v645_v51  ;;  %v408_v11 = vrot.slane %v2679_v62, 3  ;;  %2418 = vmatprep.subr.bf16.mxu0 %v2695_v12  ;;  %v2704_v31 = vld [vmem:[%s2988_s6 + $0x20] sm:$0xff]   ;;  %v2712_v51 = vld [vmem:[%s2988_s6 + $0xc] sm:$0xff]  }
  0x57   : > { %659 = vrot.lane.b32.xlu0 %v630_v13, %s2866_s26  ;;  %v653_v2 = vrot.slane %v651_v61, 1  ;;  %v2696_v13 = vld [vmem:[#allocation3 + $0xa0] sm:$0xff]   ;;  %v931_v21 = vshrl.u32 %v2699_v18, 16  ;;  %v934_v22 = vshll.u32 %v2699_v18, 16  ;;  %v939_v23 = vshrl.u32 %v2700_v19, 16  ;;  %v2716_v6 = vld [vmem:[#allocation3 + $0x70] sm:$0xff]  }
  0x58   : > { %1069 = vrot.lane.b32.xlu1 %v1058_v20, %s2866_s26  ;;  %v859_v10 = vsel %vm797_vm1, %v849_v47, %v858_v3  ;;  %2473 = vmatpush3.bf16.msra.mxu1 %v2696_v13  ;;  %v409_v17 = vsel %vm396_vm0, %v406_v41, %v408_v11  ;;  %v2701_v20 = vld [vmem:[#allocation3 + $0x60] sm:$0xff]   ;;  %v942_v24 = vshll.u32 %v2700_v19, 16  ;;  %v948_v34 = vshrl.u32 %v2704_v31, 16  ;;  %v2706_v41 = vld [vmem:[%s2988_s6 + $0xc] sm:$0xfe]   ;;  %v2721_v18 = vld [vmem:[%s2988_s6 + $0x14] sm:$0xff]  }
  0x59   : > { %v654_v14 = vsel %vm602_vm2, %v649_v8, %v653_v2  ;;  %2419 = vmatpush3.bf16.msra.mxu0 %v2697_v15  ;;  %2474 = vmatprep.subr.bf16.mxu1 %v2698_v16  ;;  %v936_v27 = vrot.slane %v934_v22, 3  ;;  %v941_v28 = vrot.slane %v939_v23, 2  ;;  %v951_v35 = vshll.u32 %v2704_v31, 16  ;;  %v2710_v47 = vld [vmem:[#allocation3 + $0x28] sm:$0xff]   ;;  %v2718_v13 = vld [vmem:[#allocation3 + $0x30] sm:$0xff]   ;;  %v3116_v15 = vld [vmem:[#allocation3 + $0x100] sm:$0xff]  }
  0x5a   : > { %2420 = vmatprep.subr.bf16.mxu0 %v2701_v20  ;;  %v944_v29 = vrot.slane %v942_v24, 3  ;;  %v727_v42 = vrot.slane %v3097_v37, 1  ;;  %v726_v45 = vrot.slane %v2706_v41, 1  ;;  %v2711_v50 = vld [vmem:[%s2988_s6 + $0x4] sm:$0xf8]   ;;  %v491_v56 = vshrl.u32 %v2712_v51, 16 }
  0x5b   : > { %414 = vrot.lane.b32.xlu0 %v403_v26, %s2866_s26  ;;  %v933_v26 = vrot.slane %v931_v21, 2  ;;  %v953_v40 = vrot.slane %v951_v35, 3  ;;  %v483_v52 = vshrl.u32 %v2711_v50, 16  ;;  %v486_v53 = vshll.u32 %v2711_v50, 16  ;;  %v2720_v16 = vld [vmem:[%s2988_s6 + $0x1c] sm:$0xff]   ;;  %v2724_v24 = vld [vmem:[%s2988_s6 + $0x28] sm:$0xff]  }
  0x5c   : > { %866 = vrot.lane.b32.xlu1 %v841_v32, %s2866_s26  ;;  %2475 = vmatpush3.bf16.msra.mxu1 %v2702_v25  ;;  %v945_v33 = vor.u32 %v944_v29, %v941_v28  ;;  %v494_v57 = vshll.u32 %v2712_v51, 16  ;;  %v493_v61 = vrot.slane %v491_v56, 3  ;;  %v729_v19 = vrot.slane %v2720_v16, 1  ;;  %v2722_v20 = vld [vmem:[#allocation3 + $0x78] sm:$0xff]   ;;  %v2726_v31 = vld [vmem:[%s2988_s6 + $0x24] sm:$0xff]  }
  0x5d   : > { %v937_v32 = vor.u32 %v936_v27, %v933_v26  ;;  %2421 = vmatpush3.bf16.msra.mxu0 %v2703_v30  ;;  %2476 = vmatprep.subr.bf16.mxu1 %v2705_v36  ;;  %v485_v58 = vrot.slane %v483_v52, 3  ;;  %v488_v59 = vrot.slane %v486_v53, 4  ;;  %v500_v21 = vshrl.u32 %v2721_v18, 16  ;;  %v2723_v23 = vld [vmem:[#allocation3 + $0x38] sm:$0xff]  }
  0x5e   : > { %2422 = vmatprep.subr.bf16.mxu0 %v2708_v43  ;;  %v496_v62 = vrot.slane %v494_v57, 4  ;;  %v503_v22 = vshll.u32 %v2721_v18, 16  ;;  %v730_v25 = vsel %vm725_vm5, %v727_v42, %v729_v19  ;;  %v957_v28 = vshrl.u32 %v2724_v24, 16  ;;  %v2725_v30 = vld [vmem:[%s2988_s6 + $0x14] sm:$0xff]   ;;  %v2727_v36 = vld [vmem:[%s2988_s6 + $0x1c] sm:$0xff]  }
  0x5f   : > { %661 = vrot.lane.b32.xlu0 %v638_v39, %s2866_s26  ;;  %v946_v38 = vsel %vm274_vm3, %v937_v32, %v945_v33  ;;  %v950_v39 = vrot.slane %v948_v34, 2  ;;  %746 = vst.msk [vmem:[#allocation2 + $0x38] sm:$0xff] %vm343_vm4, %v730_v25  ;;  %v502_v26 = vrot.slane %v500_v21, 3  ;;  %v960_v29 = vshll.u32 %v2724_v24, 16  ;;  %v2729_v43 = vld [vmem:[%s2988_s6 + $0x30] sm:$0xff]   ;;  %v2730_v52 = vld [vmem:[%s2988_s6 + $0x1c] sm:$0xff]  }
  0x60   : > { %1071 = vrot.lane.b32.xlu1 %v1060_v46, %s2866_s26  ;;  %998 = vst.msk [vmem:[#allocation2 + $0x18] sm:$0xff] %vm343_vm4, %v946_v38  ;;  %v2709_v46 = vld [vmem:[#allocation3 + $0xb0] sm:$0xff]   ;;  %v497_v8 = vor.u32 %v496_v62, %v493_v61  ;;  %v505_v27 = vrot.slane %v503_v22, 4  ;;  %v293_v35 = vshrl.u32 %v2725_v30, 16  ;;  %v296_v37 = vshll.u32 %v2725_v30, 16  ;;  %v2732_v62 = vld [vmem:[%s2988_s6 + $0x24] sm:$0xff]  }
  0x61   : > { %v3103_v44 = vor.u32 %v953_v40, %v950_v39  ;;  %2477 = vmatpush3.bf16.msra.mxu1 %v2709_v46  ;;  %2423 = vmatpush3.bf16.msra.mxu0 %v2710_v47  ;;  %v962_v34 = vrot.slane %v960_v29, 3  ;;  %v731_v38 = vrot.slane %v2726_v31, 1  ;;  %v512_v47 = vshll.u32 %v2727_v36, 16  ;;  %v2737_v25 = vld [vmem:[%s2988_s6 + $0x2c] sm:$0xff]  }
  0x62   : > { %2478 = vmatprep.subr.bf16.mxu1 %v2713_v54  ;;  %2424 = vmatprep.subr.bf16.mxu0 %v2716_v6  ;;  %v506_v32 = vor.u32 %v505_v27, %v502_v26  ;;  %v295_v41 = vrot.slane %v293_v35, 2  ;;  %v966_v50 = vshrl.u32 %v2729_v43, 16  ;;  %v969_v51 = vshll.u32 %v2729_v43, 16  ;;  %v2738_v31 = vld [vmem:[%s2988_s6 + $0x40] ss:$0 sps:$4 sm:$0x77]  }
  0x63   : > { %416 = vrot.lane.b32.xlu0 %v405_v49, %s2866_s26  ;;  %v955_v48 = vsel %vm274_vm3, %v945_v33, %v3103_v44  ;;  %v728_v49 = vsel %vm725_vm5, %v726_v45, %v727_v42  ;;  %v959_v33 = vrot.slane %v957_v28, 2  ;;  %v509_v42 = vshrl.u32 %v2727_v36, 16  ;;  %v2741_v43 = vld [vmem:[%s2988_s6 + $0x34] ss:$0 sps:$4 sm:$0xff]  }
  0x64   : > { %868 = vrot.lane.b32.xlu1 %v850_v55, %s2866_s26  ;;  %999 = vst.msk [vmem:[#allocation2 + $0x40] sm:$0xff] %vm343_vm4, %v955_v48  ;;  %745 = vst.msk [vmem:[#allocation2 + $0x10] sm:$0xff] %vm343_vm4, %v728_v49  ;;  %v2715_v55 = vld [vmem:[%s2988_s6 + $0xc] sm:$0xff]   ;;  %v507_v39 = vsel %vm481_vm6, %v497_v8, %v506_v32  ;;  %v298_v45 = vrot.slane %v296_v37, 3  ;;  %v732_v46 = vsel %vm725_vm5, %v729_v19, %v731_v38  ;;  %v514_v54 = vrot.slane %v512_v47, 4 }
  0x65   : > { %v284_v63 = vshrl.u32 %v2715_v55, 16  ;;  %v287_v0 = vshll.u32 %v2715_v55, 16  ;;  %2425 = vmatpush3.bf16.msra.mxu0 %v2718_v13  ;;  %v963_v40 = vor.u32 %v962_v34, %v959_v33  ;;  %551 = vst.msk [vmem:[#allocation2 + $0x30] sm:$0xff] %vm343_vm4, %v507_v39  ;;  %747 = vst.msk [vmem:[#allocation2 + $0x60] sm:$0xff] %vm343_vm4, %v732_v46  ;;  %v511_v49 = vrot.slane %v509_v42, 3  ;;  %v2731_v55 = vld [vmem:[%s2988_s6 + $0x2c] sm:$0xff]  }
  0x66   : > { %2426 = vmatprep.subr.bf16.mxu0 %v2722_v20  ;;  %v299_v53 = vor.u32 %v298_v45, %v295_v41  ;;  %v968_v56 = vrot.slane %v966_v50, 2  ;;  %v971_v57 = vrot.slane %v969_v51, 3  ;;  %v733_v61 = vrot.slane %v2731_v55, 1  ;;  %v2739_v34 = vld [vmem:[%s2988_s6 + $0x2c] sm:$0xff]  }
  0x67   : > { %663 = vrot.lane.b32.xlu0 %v646_v60, %s2866_s26  ;;  %v2714_v60 = vld [vmem:[%s2988_s6 + $0x4] sm:$0xfc]   ;;  %v286_v2 = vrot.slane %v284_v63, 2  ;;  %v289_v5 = vrot.slane %v287_v0, 3  ;;  %v964_v48 = vsel %vm274_vm3, %v3103_v44, %v963_v40  ;;  %v527_v30 = vshrl.u32 %v2737_v25, 16 }
  0x68   : > { %1073 = vrot.lane.b32.xlu1 %v1062_v1, %s2866_s26  ;;  %v489_v1 = vor.u32 %v488_v59, %v485_v58  ;;  %v276_v3 = vshrl.u32 %v2714_v60, 16  ;;  %v279_v4 = vshll.u32 %v2714_v60, 16  ;;  %1000 = vst.msk [vmem:[#allocation2 + $0x68] sm:$0xff] %vm343_vm4, %v964_v48  ;;  %v302_v58 = vshrl.u32 %v2730_v52, 16  ;;  %v2744_v48 = vld [vmem:[%s2988_s6 + $0x20] sm:$0xff]  }
  0x69   : > { %v290_v12 = vor.u32 %v289_v5, %v286_v2  ;;  %2427 = vmatpush3.bf16.msra.mxu0 %v2723_v23  ;;  %v305_v59 = vshll.u32 %v2730_v52, 16  ;;  %v515_v60 = vor.u32 %v514_v54, %v511_v49  ;;  %v972_v63 = vor.u32 %v971_v57, %v968_v56  ;;  %v2740_v39 = vld [vmem:[%s2988_s6 + $0x3c] ss:$0 sps:$4 sm:$0x11]  }
  0x6a   : > { %v278_v9 = vrot.slane %v276_v3, 2  ;;  %v498_v11 = vsel %vm481_vm6, %v489_v1, %v497_v8  ;;  %2526 = vmatprep.subr.bf16.mxu0 %v3116_v15  ;;  %v304_v0 = vrot.slane %v302_v58, 2  ;;  %v2733_v3 = vld [vmem:[%s2988_s6 + $0x38] sm:$0xff]   ;;  %v518_v8 = vshrl.u32 %v2732_v62, 16 }
  0x6b   : > { %418 = vrot.lane.b32.xlu0 %v407_v7, %s2866_s26  ;;  %v2717_v7 = vld [vmem:[#allocation3 + $0xb8] sm:$0xff]   ;;  %550 = vst.msk [vmem:[#allocation2 + $0x8] sm:$0xff] %vm343_vm4, %v498_v11  ;;  %v300_v44 = vsel %vm274_vm3, %v290_v12, %v299_v53  ;;  %v307_v1 = vrot.slane %v305_v59, 3  ;;  %v516_v6 = vsel %vm481_vm6, %v506_v32, %v515_v60  ;;  %v521_v2 = vshll.u32 %v2732_v62, 16 }
  0x6c   : > { %870 = vrot.lane.b32.xlu1 %v859_v10, %s2866_s26  ;;  %v281_v10 = vrot.slane %v279_v4, 3  ;;  %2479 = vmatpush3.bf16.msra.mxu1 %v2717_v7  ;;  %345 = vst.msk [vmem:[#allocation2 + $0x28] sm:$0xff] %vm343_vm4, %v300_v44  ;;  %v2734_v4 = vld [vmem:[%s2988_s6 + $0x24] sm:$0xff]   ;;  %v734_v7 = vsel %vm725_vm5, %v731_v38, %v733_v61  ;;  %552 = vst.msk [vmem:[#allocation2 + $0x58] sm:$0xff] %vm343_vm4, %v516_v6  ;;  %v973_v5 = vsel %vm274_vm3, %v963_v40, %v972_v63 }
  0x6d   : > { %2546 = vmatprep.subr.bf16.mxu1 %v3116_v15  ;;  %748 = vst.msk [vmem:[#allocation2 + $0x88] sm:$0xff] %vm343_vm4, %v734_v7  ;;  %v978_v11 = vshll.u32 %v2733_v3, 16  ;;  %1001 = vst.msk [vmem:[#allocation2 + $0x90] sm:$0xff] %vm343_vm4, %v973_v5  ;;  %v523_v13 = vrot.slane %v521_v2, 4  ;;  %v314_v16 = vshll.u32 %v2734_v4, 16  ;;  %v530_v33 = vshll.u32 %v2737_v25, 16 }
  0x6e   : > { %v529_v36 = vrot.slane %v527_v30, 3  ;;  %v984_v37 = vshrl.u32 %v2738_v31, 16  ;;  %v987_v38 = vshll.u32 %v2738_v31, 16  ;;  %v320_v41 = vshrl.u32 %v2739_v34, 16 }
  0x6f   : > { %665 = vrot.lane.b32.xlu0 %v654_v14, %s2866_s26  ;;  %v282_v14 = vor.u32 %v281_v10, %v278_v9  ;;  %v308_v9 = vor.u32 %v307_v1, %v304_v0  ;;  %v975_v10 = vshrl.u32 %v2733_v3, 16  ;;  %v980_v20 = vrot.slane %v978_v11, 3  ;;  %v2743_v57 = vld [vmem:[%s2988_s6 + $0x34] ss:$0 sps:$4 sm:$0x77]   ;;  %v2749_v11 = vld [vmem:[%s2988_s6 + $0x38] sm:$0xff]  }
  0x70   : > { %420 = vrot.lane.b32.xlu1 %v409_v17, %s2866_s26  ;;  %v316_v23 = vrot.slane %v314_v16, 3  ;;  %v532_v40 = vrot.slane %v530_v33, 4  ;;  %v323_v42 = vshll.u32 %v2739_v34, 16  ;;  %v986_v45 = vrot.slane %v984_v37, 2  ;;  %v2746_v1 = vld [vmem:[%s2988_s6 + $0x30] sm:$0xff]  }
  0x71   : > { %v291_v17 = vsel %vm274_vm3, %v282_v14, %v290_v12  ;;  %v520_v12 = vrot.slane %v518_v8, 3  ;;  %v311_v14 = vshrl.u32 %v2734_v4, 16  ;;  %v309_v18 = vsel %vm274_vm3, %v299_v53, %v308_v9  ;;  %v2745_v53 = vld [vmem:[%s2988_s6 + $0x28] sm:$0xff]   ;;  %v2748_v8 = vld [vmem:[%s2988_s6 + $0x18] sm:$0xff]  }
  0x72   : > { %344 = vst.msk [vmem:[#allocation2] sm:$0xff] %vm343_vm4, %v291_v17  ;;  %v2736_v17 = vld [vmem:[%s2988_s6 + $0x34] sm:$0xff]   ;;  %v977_v19 = vrot.slane %v975_v10, 2  ;;  %346 = vst.msk [vmem:[#allocation2 + $0x50] sm:$0xff] %vm343_vm4, %v309_v18  ;;  %v989_v46 = vrot.slane %v987_v38, 3  ;;  %v737_v47 = vrot.slane %v2740_v39, 1  ;;  %v533_v49 = vor.u32 %v532_v40, %v529_v36 }
  0x73   : > { %v524_v21 = vor.u32 %v523_v13, %v520_v12  ;;  %v313_v22 = vrot.slane %v311_v14, 2  ;;  %v735_v24 = vrot.slane %v2736_v17, 1  ;;  %v322_v50 = vrot.slane %v320_v41, 2  ;;  %v2750_v36 = vld [vmem:[%s2988_s6 + $0x40] ss:$0 sps:$4 sm:$0xff]  }
  0x74   : > { %v981_v26 = vor.u32 %v980_v20, %v977_v19  ;;  %v325_v51 = vrot.slane %v323_v42, 3  ;;  %v536_v52 = vshrl.u32 %v2741_v43, 16  ;;  %v990_v54 = vor.u32 %v989_v46, %v986_v45 }
  0x75   : > { %v525_v27 = vsel %vm481_vm6, %v515_v60, %v524_v21  ;;  %v317_v28 = vor.u32 %v316_v23, %v313_v22  ;;  %v736_v29 = vsel %vm725_vm5, %v733_v61, %v735_v24  ;;  %v738_v55 = vsel %vm725_vm5, %v735_v24, %v737_v47 }
  0x76   : > { %553 = vst.msk [vmem:[#allocation2 + $0x80] sm:$0xff] %vm343_vm4, %v525_v27  ;;  %v982_v32 = vsel %vm274_vm3, %v972_v63, %v981_v26  ;;  %749 = vst.msk [vmem:[#allocation2 + $0xb0] sm:$0xff] %vm343_vm4, %v736_v29  ;;  %v539_v56 = vshll.u32 %v2741_v43, 16  ;;  %v534_v58 = vsel %vm481_vm6, %v524_v21, %v533_v49  ;;  %v326_v59 = vor.u32 %v325_v51, %v322_v50 }
  0x77   : > { %1002 = vst.msk [vmem:[#allocation2 + $0xb8] sm:$0xff] %vm343_vm4, %v982_v32  ;;  %v318_v35 = vsel %vm274_vm3, %v308_v9, %v317_v28  ;;  %750 = vst.msk [vmem:[#allocation2 + $0xd8] sm:$0xff] %vm343_vm4, %v738_v55  ;;  %v538_v44 = vrot.slane %v536_v52, 3  ;;  %v1151_v60 = vshrl.u32 %v2744_v48, 16  ;;  %v991_v61 = vsel %vm274_vm3, %v981_v26, %v990_v54  ;;  %v2747_v26 = vld [vmem:[%s2988_s6 + $0x10] sm:$0xf8]  }
  0x78   : > { %347 = vst.msk [vmem:[#allocation2 + $0x78] sm:$0xff] %vm343_vm4, %v318_v35  ;;  %554 = vst.msk [vmem:[#allocation2 + $0xa8] sm:$0xff] %vm343_vm4, %v534_v58  ;;  %v541_v62 = vrot.slane %v539_v56, 4  ;;  %v329_v63 = vshrl.u32 %v2743_v57, 16  ;;  %v332_v0 = vshll.u32 %v2743_v57, 16  ;;  %v327_v3 = vsel %vm274_vm3, %v317_v28, %v326_v59 }
  0x79   : > { %1003 = vst.msk [vmem:[#allocation2 + $0xe0] sm:$0xff] %vm343_vm4, %v991_v61  ;;  %v1153_v4 = vrot.slane %v1151_v60, 3  ;;  %v1154_v6 = vshll.u32 %v2744_v48, 16  ;;  %v1160_v7 = vshrl.u32 %v2745_v53, 16  ;;  %348 = vst.msk [vmem:[#allocation2 + $0xa0] sm:$0xff] %vm343_vm4, %v327_v3  ;;  %v1163_v10 = vshll.u32 %v2745_v53, 16 }
  0x7a   : > { %v542_v2 = vor.u32 %v541_v62, %v538_v44  ;;  %v331_v5 = vrot.slane %v329_v63, 2  ;;  %v334_v9 = vrot.slane %v332_v0, 3  ;;  %v1169_v14 = vshrl.u32 %v2746_v1, 16  ;;  %v2728_v62 = vld [vmem:[#allocation3 + $0x108] sm:$0xff]  }
  0x7b   : > { %v1156_v12 = vrot.slane %v1154_v6, 4  ;;  %v1162_v13 = vrot.slane %v1160_v7, 3  ;;  %v1172_v16 = vshll.u32 %v2746_v1, 16  ;;  %v1165_v19 = vrot.slane %v1163_v10, 4  ;;  %v2742_v10 = vld [vmem:[#allocation3 + $0x118] sm:$0xff]  }
  0x7c   : > { %v543_v17 = vsel %vm481_vm6, %v533_v49, %v542_v2  ;;  %v335_v18 = vor.u32 %v334_v9, %v331_v5  ;;  %v1142_v20 = vshrl.u32 %v2748_v8, 16  ;;  %v1171_v22 = vrot.slane %v1169_v14, 3 }
  0x7d   : > { %555 = vst.msk [vmem:[#allocation2 + $0xd0] sm:$0xff] %vm343_vm4, %v543_v17  ;;  %v1157_v21 = vor.u32 %v1156_v12, %v1153_v4  ;;  %v1174_v23 = vrot.slane %v1172_v16, 4  ;;  %v1166_v25 = vor.u32 %v1165_v19, %v1162_v13  ;;  %v1145_v28 = vshll.u32 %v2748_v8, 16  ;;  %v2735_v4 = vld [vmem:[#allocation3 + $0x110] sm:$0xff]  }
  0x7e   : > { %v336_v24 = vsel %vm274_vm3, %v326_v59, %v335_v18  ;;  %v1144_v27 = vrot.slane %v1142_v20, 3  ;;  %v1178_v30 = vshrl.u32 %v2749_v11, 16  ;;  %v1181_v31 = vshll.u32 %v2749_v11, 16 }
  0x7f   : > { %349 = vst.msk [vmem:[#allocation2 + $0xc8] sm:$0xff] %vm343_vm4, %v336_v24  ;;  %v1175_v29 = vor.u32 %v1174_v23, %v1171_v22  ;;  %v1167_v32 = vsel %vm481_vm6, %v1157_v21, %v1166_v25  ;;  %v1134_v33 = vshrl.u32 %v2747_v26, 16  ;;  %v1137_v34 = vshll.u32 %v2747_v26, 16 }
  0x80   : > { %v1147_v35 = vrot.slane %v1145_v28, 4  ;;  %1203 = vst.msk [vmem:[#allocation2 + $0x70] sm:$0xff] %vm343_vm4, %v1167_v32  ;;  %v1180_v38 = vrot.slane %v1178_v30, 3  ;;  %v1183_v39 = vrot.slane %v1181_v31, 4  ;;  %v1187_v43 = vshrl.u32 %v2750_v36, 16 }
  0x81   : > { %v1176_v37 = vsel %vm481_vm6, %v1166_v25, %v1175_v29  ;;  %v1136_v40 = vrot.slane %v1134_v33, 3  ;;  %v1139_v41 = vrot.slane %v1137_v34, 4  ;;  %v1190_v46 = vshll.u32 %v2750_v36, 16 }
  0x82   : > { %1204 = vst.msk [vmem:[#allocation2 + $0x98] sm:$0xff] %vm343_vm4, %v1176_v37  ;;  %v1148_v42 = vor.u32 %v1147_v35, %v1144_v27  ;;  %v1184_v45 = vor.u32 %v1183_v39, %v1180_v38  ;;  %v1189_v50 = vrot.slane %v1187_v43, 3 }
  0x83   : > { %v1140_v48 = vor.u32 %v1139_v41, %v1136_v40  ;;  %v1192_v53 = vrot.slane %v1190_v46, 4 }
  0x84   : > { %v1158_v49 = vsel %vm481_vm6, %v1148_v42, %v1157_v21  ;;  %v1185_v52 = vsel %vm481_vm6, %v1175_v29, %v1184_v45 }
  0x85   : > { %1202 = vst.msk [vmem:[#allocation2 + $0x48] sm:$0xff] %vm343_vm4, %v1158_v49  ;;  %v1149_v54 = vsel %vm481_vm6, %v1140_v48, %v1148_v42  ;;  %1205 = vst.msk [vmem:[#allocation2 + $0xc0] sm:$0xff] %vm343_vm4, %v1185_v52  ;;  %v1193_v55 = vor.u32 %v1192_v53, %v1189_v50  ;;  %v2867_v48 = vmov 0   ;;  %v1804_v49 = vlaneseq }
  0x86   : > { %1201 = vst.msk [vmem:[#allocation2 + $0x20] sm:$0xff] %vm343_vm4, %v1149_v54  ;;  %221 = vst [vmem:[%s3234_s7] sm:$0xf] %v2867_v48 }
  0x87   : > { %v1194_v56 = vsel %vm481_vm6, %v1184_v45, %v1193_v55  ;;  %v1221_v39 = vld [vmem:[#allocation2 + $0x70] sm:$0xff]  ;;  %222 = vst [vmem:[%s3234_s7 + $0x4] sm:$0xf] %v2867_v48  ;;  %223 = vst [vmem:[%s3234_s7 + $0x8] sm:$0xf] %v2867_v48  ;;  %v3243_v50 = vshrl.u32 %v1804_v49, 7 }
  0x88   : > { %1206 = vst.msk [vmem:[#allocation2 + $0xe8] sm:$0xff] %vm343_vm4, %v1194_v56  ;;  %224 = vst [vmem:[%s3234_s7 + $0xc] sm:$0x1] %v2867_v48 }
  0x89   : > { %v1226_v43 = vld [vmem:[#allocation2 + $0x98] sm:$0xff]  ;;  %225 = vst [vmem:[%s3234_s7 + $0x3c] sm:$0xe] %v2867_v48  ;;  %226 = vst [vmem:[%s3234_s7 + $0x40] sm:$0xf] %v2867_v48  ;;  %v3247_v54 = vadd.s32 32, %v3243_v50 }
  0x8a   : > { %227 = vst [vmem:[%s3234_s7 + $0x44] sm:$0xf] %v2867_v48 }
  0x8c   : > { %v1231_v45 = vld [vmem:[#allocation2 + $0xc0] sm:$0xff]  ;;  %v1216_v46 = vld [vmem:[#allocation2 + $0x48] sm:$0xff] }
  0x8d   : > { %v1211_v42 = vld [vmem:[#allocation2 + $0x20] sm:$0xff] }
  0xb4   : > { %v1064_v47 = vpop.permute.xlu0 %1063  ;;  %v1066_v51 = vpop.permute.xlu1 %1065 }
  0xb5   : > { %1081 = vst.msk [vmem:[#allocation2 + $0x18] sm:$0xff] %vm428_vm7, %v1064_v47  ;;  %1082 = vst.msk [vmem:[#allocation2 + $0x40] sm:$0xff] %vm428_vm7, %v1066_v51  ;;  %v1236_v47 = vld [vmem:[#allocation2 + $0xe8] sm:$0xff]  ;;  %v1811_v51 = vadd.s32 48, %v3243_v50 }
  0xb9   : > { %v861_v57 = vpop.permute.xlu0 %860 }
  0xba   : > { %878 = vst.msk [vmem:[#allocation2 + $0x10] sm:$0xff] %vm428_vm7, %v861_v57  ;;  %v656_v59 = vpop.permute.xlu1 %655 }
  0xbb   : > { %673 = vst.msk [vmem:[#allocation2 + $0x8] sm:$0xff] %vm428_vm7, %v656_v59 }
  0xbc   : > { %v1210_v58 = vld [vmem:[#allocation2 + $0x18] sm:$0xff]  ;;  %v1215_v61 = vld [vmem:[#allocation2 + $0x40] sm:$0xff] }
  0xbd   : > { %1662 = vmatprep.mubr.bf16.mxu1 %v1210_v58  ;;  %v411_v44 = vpop.permute.xlu0 %410  ;;  %v3249_v57 = vmul.u32.u64.low 2863311531, %v1811_v51  ;;  %v3250_v58 = vmul.u32.u64.high 2863311531, %v1811_v51, %v3249_v57 }
  0xbe   : > { %429 = vst.msk [vmem:[#allocation2] sm:$0xff] %vm428_vm7, %v411_v44  ;;  %v863_v60 = vpop.permute.xlu1 %862 }
  0xbf   : > { %879 = vst.msk [vmem:[#allocation2 + $0x38] sm:$0xff] %vm428_vm7, %v863_v60 }
  0xc1   : > { %v658_v63 = vpop.permute.xlu0 %657  ;;  %v1209_v0 = vld [vmem:[#allocation2 + $0x10] sm:$0xff] }
  0xc2   : > { %674 = vst.msk [vmem:[#allocation2 + $0x30] sm:$0xff] %vm428_vm7, %v658_v63  ;;  %1663 = vmatmul.mubr.bf16.vlgmr.msra.gmra.mrb[0].mxu1 %v1209_v0  ;;  %v1068_v1 = vpop.permute.xlu1 %1067  ;;  %v1208_v3 = vld [vmem:[#allocation2 + $0x8] sm:$0xff] }
  0xc3   : > { %2550 = vmatpush3.bf16.msra.mxu1 %v3116_v15  ;;  %1670 = vmatprep.mubr.bf16.mxu1 %v1215_v61  ;;  %1083 = vst.msk [vmem:[#allocation2 + $0x68] sm:$0xff] %vm428_vm7, %v1068_v1  ;;  %v3253_v61 = vadd.s32 56, %v3243_v50  ;;  %v3261_v0 = vmul.u32.u64.low 2863311531, %v3247_v54  ;;  %v3262_v1 = vmul.u32.u64.high 2863311531, %v3247_v54, %v3261_v0 }
  0xc4   : > { %1581 = vmatprep.mubr.bf16.mxu0 %v1208_v3  ;;  %2547 = vmatprep.subr.bf16.mxu1 %v2728_v62  ;;  %v3265_v3 = vadd.s32 40, %v3243_v50 }
  0xc5   : > { %v413_v6 = vpop.permute.xlu0 %412  ;;  %v1207_v7 = vld [vmem:[#allocation2] sm:$0xff] }
  0xc6   : > { %430 = vst.msk [vmem:[#allocation2 + $0x28] sm:$0xff] %vm428_vm7, %v413_v6  ;;  %1582 = vmatmul.mubr.bf16.vlgmr.msra.gmra.mrb[0].mxu0 %v1207_v7  ;;  %v865_v8 = vpop.permute.xlu1 %864  ;;  %v1214_v2 = vld [vmem:[#allocation2 + $0x38] sm:$0xff] }
  0xc7   : > { %2527 = vmatpush3.bf16.msra.mxu0 %v3116_v15  ;;  %2551 = vmatpush3.bf16.msra.mxu1 %v2728_v62  ;;  %880 = vst.msk [vmem:[#allocation2 + $0x60] sm:$0xff] %vm428_vm7, %v865_v8 }
  0xc8   : > { %2528 = vmatprep.subr.bf16.mxu0 %v2728_v62  ;;  %2548 = vmatprep.subr.bf16.mxu1 %v2735_v4 }
  0xc9   : > { %v660_v5 = vpop.permute.xlu0 %659  ;;  %v1213_v9 = vld [vmem:[#allocation2 + $0x30] sm:$0xff] }
  0xca   : > { %675 = vst.msk [vmem:[#allocation2 + $0x58] sm:$0xff] %vm428_vm7, %v660_v5  ;;  %1671 = vmatmul.mubr.bf16.gmra.mrb[4].mxu1 %v1214_v2  ;;  %1589 = vmatprep.mubr.bf16.mxu0 %v1213_v9  ;;  %v1070_v11 = vpop.permute.xlu1 %1069  ;;  %v1220_v12 = vld [vmem:[#allocation2 + $0x68] sm:$0xff] }
  0xcb   : > { %2529 = vmatpush3.bf16.msra.mxu0 %v2728_v62  ;;  %2552 = vmatpush3.bf16.msra.mxu1 %v2735_v4  ;;  %1084 = vst.msk [vmem:[#allocation2 + $0x90] sm:$0xff] %vm428_vm7, %v1070_v11  ;;  %v3258_v62 = vld [vmem:[%s3774_s2] ss:$0 sm:$0xff] }
  0xcc   : > { %1678 = vmatprep.mubr.bf16.mxu1 %v1220_v12  ;;  %2530 = vmatprep.subr.bf16.mxu0 %v2735_v4 }
  0xcd   : > { %v415_v15 = vpop.permute.xlu0 %414  ;;  %v1212_v13 = vld [vmem:[#allocation2 + $0x28] sm:$0xff]  ;;  %2549 = vmatprep.subr.bf16.mxu1 %v2742_v10 }
  0xce   : > { %431 = vst.msk [vmem:[#allocation2 + $0x50] sm:$0xff] %vm428_vm7, %v415_v15  ;;  %1590 = vmatmul.mubr.bf16.gmra.mrb[4].mxu0 %v1212_v13  ;;  %v867_v14 = vpop.permute.xlu1 %866  ;;  %v1219_v16 = vld [vmem:[#allocation2 + $0x60] sm:$0xff]  ;;  %v3273_v12 = vmul.u32.u64.low 2863311531, %v3265_v3  ;;  %v3274_v15 = vmul.u32.u64.high 2863311531, %v3265_v3, %v3273_v12  ;;  %v3277_v13 = vadd.s32 16, %v3243_v50 }
  0xcf   : > { %2531 = vmatpush3.bf16.msra.mxu0 %v2735_v4  ;;  %2553 = vmatpush3.bf16.msra.mxu1 %v2742_v10  ;;  %881 = vst.msk [vmem:[#allocation2 + $0x88] sm:$0xff] %vm428_vm7, %v867_v14 }
  0xd0   : > { %2532 = vmatprep.subr.bf16.mxu0 %v2742_v10 }
  0xd1   : > { %v662_v17 = vpop.permute.xlu0 %661  ;;  %v1218_v18 = vld [vmem:[#allocation2 + $0x58] sm:$0xff] }
  0xd2   : > { %676 = vst.msk [vmem:[#allocation2 + $0x80] sm:$0xff] %vm428_vm7, %v662_v17  ;;  %1679 = vmatmul.mubr.bf16.gmra.mrb[8].mxu1 %v1219_v16  ;;  %1597 = vmatprep.mubr.bf16.mxu0 %v1218_v18  ;;  %v1072_v19 = vpop.permute.xlu1 %1071  ;;  %v1225_v20 = vld [vmem:[#allocation2 + $0x90] sm:$0xff]  ;;  %v1889_v18 = vshrl.u32 %v3250_v58, 3 }
  0xd3   : > { %2533 = vmatpush3.bf16.msra.mxu0 %v2742_v10  ;;  %1085 = vst.msk [vmem:[#allocation2 + $0xb8] sm:$0xff] %vm428_vm7, %v1072_v19  ;;  %1686 = vmatprep.mubr.bf16.mxu1 %v1225_v20  ;;  %v3269_v9 = vmul.u32.u64.low 2863311531, %v3253_v61  ;;  %v3270_v10 = vmul.u32.u64.high 2863311531, %v3253_v61, %v3269_v9 }
  0xd5   : > { %v417_v21 = vpop.permute.xlu0 %416  ;;  %v1217_v22 = vld [vmem:[#allocation2 + $0x50] sm:$0xff] }
  0xd6   : > { %432 = vst.msk [vmem:[#allocation2 + $0x78] sm:$0xff] %vm428_vm7, %v417_v21  ;;  %1598 = vmatmul.mubr.bf16.gmra.mrb[8].mxu0 %v1217_v22  ;;  %v869_v23 = vpop.permute.xlu1 %868  ;;  %v1224_v24 = vld [vmem:[#allocation2 + $0x88] sm:$0xff] }
  0xd7   : > { %882 = vst.msk [vmem:[#allocation2 + $0xb0] sm:$0xff] %vm428_vm7, %v869_v23  ;;  %v3284_v23 = vadd.s32 24, %v3243_v50 }
  0xd9   : > { %v664_v25 = vpop.permute.xlu0 %663  ;;  %v1223_v26 = vld [vmem:[#allocation2 + $0x80] sm:$0xff] }
  0xda   : > { %677 = vst.msk [vmem:[#allocation2 + $0xa8] sm:$0xff] %vm428_vm7, %v664_v25  ;;  %1687 = vmatmul.mubr.bf16.gmra.mrb[12].mxu1 %v1224_v24  ;;  %1605 = vmatprep.mubr.bf16.mxu0 %v1223_v26  ;;  %v1074_v27 = vpop.permute.xlu1 %1073  ;;  %v1230_v28 = vld [vmem:[#allocation2 + $0xb8] sm:$0xff]  ;;  %v1867_v26 = vshrl.u32 %v3262_v1, 3 }
  0xdb   : > { %1086 = vst.msk [vmem:[#allocation2 + $0xe0] sm:$0xff] %vm428_vm7, %v1074_v27  ;;  %1694 = vmatprep.mubr.bf16.mxu1 %v1230_v28 }
  0xdd   : > { %v419_v29 = vpop.permute.xlu0 %418  ;;  %v1222_v30 = vld [vmem:[#allocation2 + $0x78] sm:$0xff] }
  0xde   : > { %433 = vst.msk [vmem:[#allocation2 + $0xa0] sm:$0xff] %vm428_vm7, %v419_v29  ;;  %1606 = vmatmul.mubr.bf16.gmra.mrb[12].mxu0 %v1222_v30  ;;  %v871_v31 = vpop.permute.xlu1 %870  ;;  %v1229_v32 = vld [vmem:[#allocation2 + $0xb0] sm:$0xff]  ;;  %v1890_v29 = vmul.u32 12, %v1889_v18 }
  0xdf   : > { %883 = vst.msk [vmem:[#allocation2 + $0xd8] sm:$0xff] %vm428_vm7, %v871_v31  ;;  %v3290_v30 = vmul.u32.u64.low 2863311531, %v3277_v13  ;;  %v3291_v31 = vmul.u32.u64.high 2863311531, %v3277_v13, %v3290_v30 }
  0xe0   : > { %v3308_v49 = vsub.s32 %v1811_v51, %v1890_v29 }
  0xe1   : > { %v666_v33 = vpop.permute.xlu0 %665  ;;  %v1228_v34 = vld [vmem:[#allocation2 + $0xa8] sm:$0xff] }
  0xe2   : > { %1695 = vmatmul.mubr.bf16.gmra.mrb[16].mxu1 %v1229_v32  ;;  %678 = vst.msk [vmem:[#allocation2 + $0xd0] sm:$0xff] %vm428_vm7, %v666_v33  ;;  %1613 = vmatprep.mubr.bf16.mxu0 %v1228_v34  ;;  %v421_v35 = vpop.permute.xlu1 %420  ;;  %v1235_v36 = vld [vmem:[#allocation2 + $0xe0] sm:$0xff]  ;;  %v3294_v33 = vmul.u32.u64.low 2863311531, %v3243_v50  ;;  %v3295_v34 = vmul.u32.u64.high 2863311531, %v3243_v50, %v3294_v33  ;;  %vm1955_vm8 = vcmp.ne.s32.totalorder %v3308_v49, 0  ;;  %vm1967_vm9 = vcmp.lt.s32.totalorder %v3308_v49, 0 }
  0xe3   : > { %434 = vst.msk [vmem:[#allocation2 + $0xc8] sm:$0xff] %vm428_vm7, %v421_v35  ;;  %1702 = vmatprep.mubr.bf16.mxu1 %v1235_v36  ;;  %vm3355_vm11 = vmand %vm1967_vm9, %vm1955_vm8 }
  0xe4   : > { %v1823_v18 = vshrl.u32 %v3295_v34, 3 }
  0xe5   : > { %v1227_v37 = vld [vmem:[#allocation2 + $0xa0] sm:$0xff] }
  0xe6   : > { %1614 = vmatmul.mubr.bf16.gmra.mrb[16].mxu0 %v1227_v37  ;;  %v1234_v38 = vld [vmem:[#allocation2 + $0xd8] sm:$0xff] }
  0xe9   : > { %v1233_v40 = vld [vmem:[#allocation2 + $0xd0] sm:$0xff] }
  0xea   : > { %1703 = vmatmul.mubr.bf16.gmra.mrb[20].mxu1 %v1234_v38  ;;  %1621 = vmatprep.mubr.bf16.mxu0 %v1233_v40  ;;  %v1232_v41 = vld [vmem:[#allocation2 + $0xc8] sm:$0xff] }
  0xeb   : > { %2538 = vmatprep.mubr.msk.bf16.mxu1 %vm343_vm4, %v1221_v39  ;;  %v3299_v38 = vmul.u32.u64.low 2863311531, %v3284_v23  ;;  %v3300_v39 = vmul.u32.u64.high 2863311531, %v3284_v23, %v3299_v38 }
  0xee   : > { %1622 = vmatmul.mubr.bf16.gmra.mrb[20].mxu0 %v1232_v41  ;;  %v1868_v41 = vmul.u32 12, %v1867_v26 }
  0xef   : > { %2534 = vmatprep.mubr.msk.bf16.mxu0 %vm343_vm4, %v1211_v42  ;;  %v1900_v42 = vshrl.u32 %v3270_v10, 3 }
  0xf2   : > { %2539 = vmatmul.mubr.msk.bf16.vlgmr.msra.gmra.mrb[24].mxu1 %vm343_vm4, %v1226_v43  ;;  %v1878_v43 = vshrl.u32 %v3274_v15, 3 }
  0xf3   : > { %2542 = vmatprep.mubr.msk.bf16.mxu1 %vm343_vm4, %v1231_v45  ;;  %v3305_v45 = vadd.s32 8, %v3243_v50 }
  0xf5   : > { %v3324_v51 = vmul.u32.u64.low 2863311531, %v3305_v45  ;;  %v3325_v0 = vmul.u32.u64.high 2863311531, %v3305_v45, %v3324_v51 }
  0xf6   : > { %2535 = vmatmul.mubr.msk.bf16.vlgmr.msra.gmra.mrb[24].mxu0 %vm343_vm4, %v1216_v46 }
  0xfa   : > { %2543 = vmatmul.mubr.msk.bf16.gmra.mrb[28].mxu1 %vm343_vm4, %v1236_v47 }
 0x195   : > { %v2480_v52 = vpop.f32.mrb[0].mxu1 }
 0x196   : > { %v2481_v53 = vpop.f32.mrb[1].mxu1 }
 0x197   : > { %v2482_v55 = vadd.f32 %v2481_v53, %v2480_v52  ;;  %v2483_v56 = vpop.f32.mrb[2].mxu1 }
 0x198   : > { %v2484_v59 = vpop.f32.mrb[3].mxu1 }
 0x199   : > { %v2485_v44 = vadd.f32 %v2484_v59, %v2483_v56  ;;  %v2428_v60 = vpop.f32.mrb[0].mxu0  ;;  %v3318_v59 = vadd.s32 64, %v3243_v50 }
 0x19a   : > { %v2429_v63 = vpop.f32.mrb[1].mxu0 }
 0x19b   : > { %v2430_v4 = vadd.f32 %v2429_v63, %v2428_v60  ;;  %v2431_v6 = vpop.f32.mrb[2].mxu0  ;;  %v3321_v60 = vsub.s32 %v3247_v54, %v1868_v41  ;;  %v1901_v63 = vmul.u32 12, %v1900_v42  ;;  %v3335_v54 = vadd.s32 88, %v3243_v50 }
 0x19c   : > { %v2432_v7 = vpop.f32.mrb[3].mxu0  ;;  %v3339_v12 = vmul.u32.u64.low 2863311531, %v3318_v59  ;;  %v3340_v15 = vmul.u32.u64.high 2863311531, %v3318_v59, %v3339_v12 }
 0x19d   : > { %v1584_v8 = vadd.f32 %v2430_v4, %v3258_v62  ;;  %v2433_v2 = vadd.f32 %v2432_v7, %v2431_v6  ;;  %v2486_v5 = vpop.f32.mrb[4].mxu1  ;;  %v1879_v6 = vmul.u32 12, %v1878_v43  ;;  %v1845_v7 = vshrl.u32 %v3291_v31, 3 }
 0x19e   : > { %v2487_v11 = vpop.f32.mrb[5].mxu1  ;;  %vm1953_vm10 = vcmp.ne.s32.totalorder %v3321_v60, 0  ;;  %v3363_v29 = vmul.u32.u64.low 2863311531, %v3335_v54  ;;  %v3364_v30 = vmul.u32.u64.high 2863311531, %v3335_v54, %v3363_v29  ;;  %v3367_v31 = vadd.s32 72, %v3243_v50 }
 0x19f   : > { %v1587_v14 = vadd.f32 %v2433_v2, %v3258_v62  ;;  %v2488_v16 = vadd.f32 %v2487_v11, %v2486_v5  ;;  %v2489_v17 = vpop.f32.mrb[6].mxu1  ;;  %v3281_v19 = vadd.f32 %v2482_v55, %v1584_v8  ;;  %v3313_v55 = vadd.s32 80, %v3243_v50 }
 0x1a0   : > { %v2490_v20 = vpop.f32.mrb[7].mxu1  ;;  %vm1965_vm12 = vcmp.lt.s32.totalorder %v3321_v60, 0  ;;  %v3371_v34 = vadd.s32 12, %v3321_v60  ;;  %v3380_v38 = vsub.s32 %v3265_v3, %v1879_v6  ;;  %v1911_v51 = vshrl.u32 %v3340_v15, 3 }
 0x1a1   : > { %v2491_v21 = vadd.f32 %v2490_v20, %v2489_v17  ;;  %v2434_v22 = vpop.f32.mrb[4].mxu0  ;;  %v3286_v24 = vadd.f32 %v2485_v44, %v1587_v14  ;;  %v3331_v2 = vmul.u32.u64.low 2863311531, %v3313_v55  ;;  %v3332_v5 = vmul.u32.u64.high 2863311531, %v3313_v55, %v3331_v2  ;;  %vm3402_vm15 = vmand %vm1965_vm12, %vm1953_vm10 }
 0x1a2   : > { %v2435_v25 = vpop.f32.mrb[5].mxu0  ;;  %v3347_v17 = vsub.s32 %v3253_v61, %v1901_v63  ;;  %vm1954_vm0 = vcmp.ne.s32.totalorder %v3380_v38, 0  ;;  %vm1966_vm1 = vcmp.lt.s32.totalorder %v3380_v38, 0 }
 0x1a3   : > { %v2436_v27 = vadd.f32 %v2435_v25, %v2434_v22  ;;  %v2437_v28 = vpop.f32.mrb[6].mxu0  ;;  %vm3443_vm5 = vmand %vm1966_vm1, %vm1954_vm0 }
 0x1a4   : > { %v2438_v32 = vpop.f32.mrb[7].mxu0  ;;  %vm1956_vm13 = vcmp.ne.s32.totalorder %v3347_v17, 0  ;;  %vm1968_vm14 = vcmp.lt.s32.totalorder %v3347_v17, 0  ;;  %v3395_v63 = vadd.s32 12, %v3347_v17 }
 0x1a5   : > { %v1592_v35 = vadd.f32 %v2436_v27, %v3258_v62  ;;  %v2439_v36 = vadd.f32 %v2438_v32, %v2437_v28  ;;  %v2492_v37 = vpop.f32.mrb[8].mxu1  ;;  %v1856_v27 = vshrl.u32 %v3300_v39, 3  ;;  %v1846_v28 = vmul.u32 12, %v1845_v7  ;;  %vm3418_vm2 = vmand %vm1968_vm14, %vm1956_vm13 }
 0x1a6   : > { %v2493_v40 = vpop.f32.mrb[9].mxu1  ;;  %v1824_v39 = vmul.u32 12, %v1823_v18  ;;  %v1990_v18 = vadd.s32 12, %v3380_v38 }
 0x1a7   : > { %v1595_v46 = vadd.f32 %v2439_v36, %v3258_v62  ;;  %v2494_v47 = vadd.f32 %v2493_v40, %v2492_v37  ;;  %v2495_v48 = vpop.f32.mrb[10].mxu1  ;;  %v3310_v52 = vadd.f32 %v2488_v16, %v1592_v35  ;;  %v3343_v16 = vadd.s32 12, %v3308_v49 }
 0x1a8   : > { %v2496_v53 = vpop.f32.mrb[11].mxu1  ;;  %v1834_v40 = vshrl.u32 %v3325_v0, 3  ;;  %v1857_v43 = vmul.u32 12, %v1856_v27 }
 0x1a9   : > { %v2497_v56 = vadd.f32 %v2496_v53, %v2495_v48  ;;  %v2440_v57 = vpop.f32.mrb[8].mxu0  ;;  %v3315_v58 = vadd.f32 %v2491_v21, %v1595_v46  ;;  %v2003_v37 = vsel %vm3355_vm11, %v3343_v16, %v3308_v49  ;;  %v1933_v48 = vshrl.u32 %v3332_v5, 3 }
 0x1aa   : > { %v2441_v44 = vpop.f32.mrb[9].mxu0  ;;  %v3390_v53 = vmul.u32.u64.low 2863311531, %v3367_v31  ;;  %v3391_v3 = vmul.u32.u64.high 2863311531, %v3367_v31, %v3390_v53  ;;  %vm3492_vm14 = vcmp.lt.s32.totalorder %v2003_v37, 8 }
 0x1ab   : > { %v2442_v1 = vadd.f32 %v2441_v44, %v2440_v57  ;;  %v2443_v4 = vpop.f32.mrb[10].mxu0 }
 0x1ac   : > { %v2444_v8 = vpop.f32.mrb[11].mxu0 }
 0x1ad   : > { %v1600_v9 = vadd.f32 %v2442_v1, %v3258_v62  ;;  %v2445_v10 = vadd.f32 %v2444_v8, %v2443_v4  ;;  %v2498_v11 = vpop.f32.mrb[12].mxu1  ;;  %v3409_v1 = vsub.s32 %v3243_v50, %v1824_v39  ;;  %v1835_v4 = vmul.u32 12, %v1834_v40 }
 0x1ae   : > { %v2499_v14 = vpop.f32.mrb[13].mxu1  ;;  %v2002_v40 = vsel %vm3443_vm5, %v1990_v18, %v3380_v38 }
 0x1af   : > { %v1603_v20 = vadd.f32 %v2445_v10, %v3258_v62  ;;  %v2500_v21 = vadd.f32 %v2499_v14, %v2498_v11  ;;  %v2501_v22 = vpop.f32.mrb[14].mxu1  ;;  %v3359_v26 = vadd.f32 %v2494_v47, %v1600_v9  ;;  %v3386_v47 = vsub.s32 %v3277_v13, %v1846_v28 }
 0x1b0   : > { %v2502_v61 = vpop.f32.mrb[15].mxu1  ;;  %v3423_v9 = vsub.s32 %v3284_v23, %v1857_v43  ;;  %v1934_v10 = vmul.u32 12, %v1933_v48  ;;  %v1944_v11 = vshrl.u32 %v3364_v30, 3  ;;  %v2001_v23 = vsel %vm3402_vm15, %v3371_v34, %v3321_v60 }
 0x1b1   : > { %v2503_v32 = vadd.f32 %v2502_v61, %v2501_v22  ;;  %v2446_v33 = vpop.f32.mrb[12].mxu0  ;;  %v3373_v35 = vadd.f32 %v2497_v56, %v1603_v20  ;;  %vm1951_vm3 = vcmp.ne.s32.totalorder %v3386_v47, 0  ;;  %vm1963_vm4 = vcmp.lt.s32.totalorder %v3386_v47, 0 }
 0x1b2   : > { %v2447_v36 = vpop.f32.mrb[13].mxu0  ;;  %v1912_v20 = vmul.u32 12, %v1911_v51  ;;  %v2004_v22 = vsel %vm3418_vm2, %v3395_v63, %v3347_v17  ;;  %v1987_v61 = vadd.s32 12, %v3386_v47  ;;  %v3449_v28 = vsub.s32 %v3305_v45, %v1835_v4  ;;  %vm3455_vm6 = vmand %vm1963_vm4, %vm1951_vm3 }
 0x1b3   : > { %v2448_v41 = vadd.f32 %v2447_v36, %v2446_v33  ;;  %v2449_v42 = vpop.f32.mrb[14].mxu0  ;;  %vm1949_vm7 = vcmp.ne.s32.totalorder %v3409_v1, 0  ;;  %vm1961_vm8 = vcmp.lt.s32.totalorder %v3409_v1, 0  ;;  %vm1952_vm9 = vcmp.ne.s32.totalorder %v3423_v9, 0 }
 0x1b4   : > { %v2450_v46 = vpop.f32.mrb[15].mxu0  ;;  %vm1964_vm10 = vcmp.lt.s32.totalorder %v3423_v9, 0  ;;  %v3464_v45 = vsub.s32 %v3313_v55, %v1934_v10  ;;  %v1922_v33 = vshrl.u32 %v3391_v3, 3  ;;  %v1999_v55 = vsel %vm3455_vm6, %v1987_v61, %v3386_v47  ;;  %vm3479_vm12 = vmand %vm1961_vm8, %vm1949_vm7 }
 0x1b5   : > { %v1608_v56 = vadd.f32 %v2448_v41, %v3258_v62  ;;  %v2451_v57 = vadd.f32 %v2450_v46, %v2449_v42  ;;  %v2504_v44 = vpop.f32.mrb[16].mxu1  ;;  %v3472_v41 = vsub.s32 %v3318_v59, %v1912_v20  ;;  %v1985_v46 = vadd.s32 12, %v3409_v1  ;;  %vm3500_vm15 = vmand %vm1964_vm10, %vm1952_vm9 }
 0x1b6   : > { %v2505_v0 = vpop.f32.mrb[17].mxu1  ;;  %v1988_v48 = vadd.s32 12, %v3423_v9  ;;  %vm1950_vm13 = vcmp.ne.s32.totalorder %v3449_v28, 0  ;;  %vm1962_vm0 = vcmp.lt.s32.totalorder %v3449_v28, 0  ;;  %vm3507_vm1 = vcmp.lt.s32.totalorder %v2001_v23, 8 }
 0x1b7   : > { %v1611_v6 = vadd.f32 %v2451_v57, %v3258_v62  ;;  %v2506_v7 = vadd.f32 %v2505_v0, %v2504_v44  ;;  %v2507_v8 = vpop.f32.mrb[18].mxu1  ;;  %v3412_v2 = vadd.f32 %v2500_v21, %v1608_v56  ;;  %vm1959_vm11 = vcmp.ne.s32.totalorder %v3464_v45, 0  ;;  %vm3538_vm7 = vmand %vm1962_vm0, %vm1950_vm13 }
 0x1b8   : > { %v2508_v50 = vpop.f32.mrb[19].mxu1  ;;  %vm1971_vm2 = vcmp.lt.s32.totalorder %v3464_v45, 0  ;;  %v1923_v16 = vmul.u32 12, %v1922_v33  ;;  %vm3516_vm3 = vcmp.lt.s32.totalorder %v2004_v22, 8  ;;  %vm1957_vm4 = vcmp.ne.s32.totalorder %v3472_v41, 0 }
 0x1b9   : > { %v2509_v12 = vadd.f32 %v2508_v50, %v2507_v8  ;;  %v2452_v15 = vpop.f32.mrb[16].mxu0  ;;  %v3428_v14 = vadd.f32 %v2503_v32, %v1611_v6  ;;  %v1945_v32 = vmul.u32 12, %v1944_v11  ;;  %vm1969_vm5 = vcmp.lt.s32.totalorder %v3472_v41, 0  ;;  %vm3548_vm10 = vmand %vm1971_vm2, %vm1959_vm11 }
 0x1ba   : > { %v2453_v21 = vpop.f32.mrb[17].mxu0  ;;  %vm3524_vm6 = vcmp.lt.s32.totalorder %v2002_v40, 8  ;;  %v2000_v4 = vsel %vm3500_vm15, %v1988_v48, %v3423_v9  ;;  %v1995_v8 = vadd.s32 12, %v3464_v45  ;;  %vm2093_vm8 = vcmask 1040384   ;;  %vm3561_vm13 = vmand %vm1969_vm5, %vm1957_vm4 }
 0x1bb   : > { %v2454_v29 = vadd.f32 %v2453_v21, %v2452_v15  ;;  %v2455_v60 = vpop.f32.mrb[18].mxu0  ;;  %v3514_v49 = vsub.s32 %v3335_v54, %v1945_v32  ;;  %v1997_v54 = vsel %vm3479_vm12, %v1985_v46, %v3409_v1  ;;  %vm2094_vm9 = vcmask 1044484  }
 0x1bc   : > { %v2456_v30 = vpop.f32.mrb[19].mxu0  ;;  %v1993_v9 = vadd.s32 12, %v3472_v41  ;;  %vm3553_vm12 = vcmp.lt.s32.totalorder %v1999_v55, 8  ;;  %v3568_v15 = vsub.s32 %v3367_v31, %v1923_v16  ;;  %vm3571_vm11 = vcmp.lt.s32.totalorder %v1997_v54, 8 }
 0x1bd   : > { %v1616_v34 = vadd.f32 %v2454_v29, %v3258_v62  ;;  %v2457_v36 = vadd.f32 %v2456_v30, %v2455_v60  ;;  %v2510_v39 = vpop.f32.mrb[20].mxu1  ;;  %vm1960_vm15 = vcmp.ne.s32.totalorder %v3514_v49, 0  ;;  %vm1972_vm0 = vcmp.lt.s32.totalorder %v3514_v49, 0 }
 0x1be   : > { %v2511_v42 = vpop.f32.mrb[21].mxu1  ;;  %vm3575_vm2 = vcmp.lt.s32.totalorder %v2000_v4, 8  ;;  %v2007_v29 = vsel %vm3548_vm10, %v1995_v8, %v3464_v45  ;;  %v1996_v60 = vadd.s32 12, %v3514_v49  ;;  %vm3598_vm4 = vmand %vm1972_vm0, %vm1960_vm15  ;;  %vm1958_vm5 = vcmp.ne.s32.totalorder %v3568_v15, 0 }
 0x1bf   : > { %v1619_v59 = vadd.f32 %v2457_v36, %v3258_v62  ;;  %v2512_v38 = vadd.f32 %v2511_v42, %v2510_v39  ;;  %v2513_v53 = vpop.f32.mrb[22].mxu1  ;;  %v3505_v56 = vadd.f32 %v2506_v7, %v1616_v34  ;;  %v1986_v7 = vadd.s32 12, %v3449_v28 }
 0x1c0   : > { %v2514_v25 = vpop.f32.mrb[23].mxu1 }
 0x1c1   : > { %v2515_v37 = vadd.f32 %v2514_v25, %v2513_v53  ;;  %v2458_v44 = vpop.f32.mrb[20].mxu0  ;;  %v3522_v51 = vadd.f32 %v2509_v12, %v1619_v59  ;;  %v1998_v31 = vsel %vm3538_vm7, %v1986_v7, %v3449_v28  ;;  %vm1970_vm7 = vcmp.lt.s32.totalorder %v3568_v15, 0 }
 0x1c2   : > { %v2459_v0 = vpop.f32.mrb[21].mxu0  ;;  %vm3616_vm10 = vcmp.lt.s32.totalorder %v1998_v31, 8 }
 0x1c3   : > { %v2460_v5 = vadd.f32 %v2459_v0, %v2458_v44  ;;  %v2461_v50 = vpop.f32.mrb[22].mxu0 }
 0x1c4   : > { %v2462_v10 = vpop.f32.mrb[23].mxu0 }
 0x1c5   : > { %v1624_v18 = vadd.f32 %v2460_v5, %v3258_v62  ;;  %v2463_v20 = vadd.f32 %v2462_v10, %v2461_v50  ;;  %v2540_v21 = vpop.f32.mrb[24].mxu1 }
 0x1c6   : > { %v1770_v27 = vadd.f32 %v2540_v21, %v3412_v2  ;;  %v1761_v61 = vpop.f32.mrb[25].mxu1  ;;  %v2005_v2 = vsel %vm3561_vm13, %v1993_v9, %v3472_v41  ;;  %v1994_v41 = vadd.s32 12, %v3568_v15  ;;  %vm3633_vm13 = vmor %vm2093_vm8, %vm2094_vm9 }
 0x1c7   : > { %v1627_v17 = vadd.f32 %v2463_v20, %v3258_v62  ;;  %v1762_v30 = vadd.f32 %v1761_v61, %v3359_v26  ;;  %v2541_v32 = vpop.f32.mrb[26].mxu1  ;;  %v3589_v33 = vadd.f32 %v2512_v38, %v1624_v18  ;;  %vm3649_vm8 = vmand %vm1970_vm7, %vm1958_vm5 }
 0x1c8   : > { %v1798_v45 = vmax.f32 %v1770_v27, 0.0  ;;  %v1773_v62 = vadd.f32 %v2541_v32, %v3428_v14  ;;  %v1764_v34 = vpop.f32.mrb[27].mxu1  ;;  %v2008_v14 = vsel %vm3598_vm4, %v1996_v60, %v3514_v49  ;;  %v2006_v23 = vsel %vm3649_vm8, %v1994_v41, %v3568_v15 }
 0x1c9   : > { %v1796_v26 = vmax.f32 %v1762_v30, 0.0  ;;  %v1765_v36 = vadd.f32 %v1764_v34, %v3373_v35  ;;  %v2536_v39 = vpop.f32.mrb[24].mxu0  ;;  %v1708_v40 = vadd.f32 %v2515_v37, %v1627_v17 }
 0x1ca   : > { %v2051_v42 = vsel %vm3492_vm14, %v1798_v45, 0.0  ;;  %v1799_v55 = vmax.f32 %v1773_v62, 0.0  ;;  %v1754_v43 = vadd.f32 %v2536_v39, %v3310_v52  ;;  %v1745_v46 = vpop.f32.mrb[25].mxu0  ;;  %vm3623_vm14 = vcmp.lt.s32.totalorder %v2007_v29, 8 }
 0x1cb   : > { %v2406_v48 = vpack.c.bf16 %v2051_v42, %v2051_v42  ;;  %v2049_v59 = vsel %vm3507_vm1, %v1796_v26, 0.0  ;;  %v1797_v35 = vmax.f32 %v1765_v36, 0.0  ;;  %v1746_v38 = vadd.f32 %v1745_v46, %v3281_v19  ;;  %v2537_v53 = vpop.f32.mrb[26].mxu0 }
 0x1cc   : > { %v2404_v47 = vpack.c.bf16 %v2049_v59, %v2049_v59  ;;  %v2052_v52 = vsel %vm3516_vm3, %v1799_v55, 0.0  ;;  %v1794_v25 = vmax.f32 %v1754_v43, 0.0  ;;  %v1757_v16 = vadd.f32 %v2537_v53, %v3315_v58  ;;  %v1748_v49 = vpop.f32.mrb[27].mxu0 }
 0x1cd   : > { %vm3627_vm1 = vcmp.lt.s32.totalorder %v2005_v2, 8  ;;  %v2113_v19 = vrot.slane %v2406_v48, 7  ;;  %v2407_v44 = vpack.c.bf16 %v2052_v52, %v2052_v52  ;;  %v2050_v58 = vsel %vm3524_vm6, %v1797_v35, 0.0  ;;  %v2544_v54 = vpop.f32.mrb[28].mxu1 }
 0x1ce   : > { %v1792_v63 = vmax.f32 %v1746_v38, 0.0  ;;  %vm3639_vm3 = vcmp.lt.s32.totalorder %v2008_v14, 8  ;;  %v2107_v6 = vrot.slane %v2404_v47, 7  ;;  %v2405_v7 = vpack.c.bf16 %v2050_v58, %v2050_v58  ;;  %v1777_v50 = vpop.f32.mrb[29].mxu1 }
 0x1cf   : > { %v2047_v8 = vsel %vm3553_vm12, %v1794_v25, 0.0  ;;  %v1795_v5 = vmax.f32 %v1757_v16, 0.0  ;;  %v2115_v1 = vrot.slane %v2113_v19, 4  ;;  %v2116_v9 = vrot.slane %v2407_v44, 7  ;;  %v2545_v11 = vpop.f32.mrb[30].mxu1 }
 0x1d0   : > { %v2402_v10 = vpack.c.bf16 %v2047_v8, %v2047_v8  ;;  %v2045_v12 = vsel %vm3571_vm11, %v1792_v63, 0.0  ;;  %v2109_v18 = vrot.slane %v2107_v6, 4  ;;  %v2110_v20 = vrot.slane %v2405_v7, 7  ;;  %v1780_v61 = vpop.f32.mrb[31].mxu1 }
 0x1d1   : > { %v2400_v21 = vpack.c.bf16 %v2045_v12, %v2045_v12  ;;  %v2048_v27 = vsel %vm3575_vm2, %v1795_v5, 0.0  ;;  %v2117_v31 = vsel %vm3633_vm13, %v2115_v1, %v2116_v9  ;;  %v1749_v22 = vadd.f32 %v1748_v49, %v3286_v24 }
 0x1d2   : > { %v2101_v29 = vrot.slane %v2402_v10, 7  ;;  %v2403_v60 = vpack.c.bf16 %v2048_v27, %v2048_v27  ;;  %2151 = vst [vmem:[%s3234_s7 + $0x28] sm:$0xf] %v2117_v31  ;;  %v2111_v17 = vsel %vm3633_vm13, %v2109_v18, %v2110_v20  ;;  %v2112_v30 = vrot.slane %v2110_v20, 4 }
 0x1d3   : > { %v2096_v32 = vrot.slane %v2400_v21, 7  ;;  %2149 = vst [vmem:[%s3234_s7 + $0x20] sm:$0xf] %v2111_v17  ;;  %v1786_v45 = vadd.f32 %v2544_v54, %v3589_v33  ;;  %v1778_v62 = vadd.f32 %v1777_v50, %v3505_v56  ;;  %v1793_v34 = vmax.f32 %v1749_v22, 0.0 }
 0x1d4   : > { %v2103_v2 = vrot.slane %v2101_v29, 4  ;;  %v2104_v28 = vrot.slane %v2403_v60, 7  ;;  %v2114_v15 = vsel %vm3633_vm13, %v2112_v30, %v2113_v19  ;;  %v1789_v26 = vadd.f32 %v2545_v11, %v1708_v40 }
 0x1d5   : > { %2144 = vst [vmem:[%s3234_s7 + $0xc] sm:$0xe] %v2096_v32  ;;  %vm3672_vm6 = vcmp.lt.s32.totalorder %v2006_v23, 8  ;;  %2150 = vst [vmem:[%s3234_s7 + $0x24] sm:$0xf] %v2114_v15  ;;  %v1802_v41 = vmax.f32 %v1786_v45, 0.0  ;;  %v1781_v40 = vadd.f32 %v1780_v61, %v3522_v51 }
 0x1d6   : > { %v2105_v24 = vsel %vm3633_vm13, %v2103_v2, %v2104_v28  ;;  %v2106_v39 = vrot.slane %v2104_v28, 4  ;;  %v1800_v33 = vmax.f32 %v1778_v62, 0.0  ;;  %v2097_v42 = vrot.slane %v2096_v32, 4 }
 0x1d7   : > { %2147 = vst [vmem:[%s3234_s7 + $0x18] sm:$0xf] %v2105_v24  ;;  %v2046_v56 = vsel %vm3616_vm10, %v1793_v34, 0.0  ;;  %v1803_v55 = vmax.f32 %v1789_v26, 0.0  ;;  %v2055_v14 = vsel %vm3623_vm14, %v1802_v41, 0.0  ;;  %v1801_v53 = vmax.f32 %v1781_v40, 0.0 }
 0x1d8   : > { %v2108_v43 = vsel %vm3633_vm13, %v2106_v39, %v2107_v6  ;;  %v2401_v46 = vpack.c.bf16 %v2046_v56, %v2046_v56  ;;  %v2053_v48 = vsel %vm3627_vm1, %v1800_v33, 0.0  ;;  %v2410_v59 = vpack.c.bf16 %v2055_v14, %v2055_v14 }
 0x1d9   : > { %2148 = vst [vmem:[%s3234_s7 + $0x1c] sm:$0xf] %v2108_v43  ;;  %v2408_v35 = vpack.c.bf16 %v2053_v48, %v2053_v48  ;;  %v2056_v38 = vsel %vm3639_vm3, %v1803_v55, 0.0  ;;  %v2118_v47 = vrot.slane %v2116_v9, 4  ;;  %v2054_v16 = vsel %vm3672_vm6, %v1801_v53, 0.0 }
 0x1da   : > { %v2098_v51 = vrot.slane %v2401_v46, 7  ;;  %v2411_v3 = vpack.c.bf16 %v2056_v38, %v2056_v38  ;;  %v2125_v52 = vrot.slane %v2410_v59, 7  ;;  %v2409_v19 = vpack.c.bf16 %v2054_v16, %v2054_v16 }
 0x1db   : > { %v2119_v25 = vrot.slane %v2408_v35, 7 }
 0x1dc   : > { %v2099_v49 = vsel %vm3633_vm13, %v2097_v42, %v2098_v51  ;;  %v2100_v37 = vrot.slane %v2098_v51, 4  ;;  %v2128_v57 = vrot.slane %v2411_v3, 7  ;;  %v2127_v44 = vrot.slane %v2125_v52, 4 }
 0x1dd   : > { %2145 = vst [vmem:[%s3234_s7 + $0x10] sm:$0xf] %v2099_v49  ;;  %v2120_v58 = vsel %vm3633_vm13, %v2118_v47, %v2119_v25  ;;  %v2121_v63 = vrot.slane %v2119_v25, 4  ;;  %v2122_v6 = vrot.slane %v2409_v19, 7 }
 0x1de   : > { %v2102_v54 = vsel %vm3633_vm13, %v2100_v37, %v2101_v29  ;;  %2152 = vst [vmem:[%s3234_s7 + $0x2c] sm:$0xf] %v2120_v58  ;;  %v2130_v4 = vrot.slane %v2128_v57, 4  ;;  %v2129_v7 = vsel %vm3633_vm13, %v2127_v44, %v2128_v57 }
 0x1df   : > { %2146 = vst [vmem:[%s3234_s7 + $0x14] sm:$0xf] %v2102_v54  ;;  %2155 = vst [vmem:[%s3234_s7 + $0x38] sm:$0xf] %v2129_v7  ;;  %v2123_v8 = vsel %vm3633_vm13, %v2121_v63, %v2122_v6  ;;  %v2124_v5 = vrot.slane %v2122_v6, 4 }
 0x1e0   : > { %2156 = vst [vmem:[%s3234_s7 + $0x3c] sm:$0x1] %v2130_v4  ;;  %2153 = vst [vmem:[%s3234_s7 + $0x30] sm:$0xf] %v2123_v8 }
 0x1e1   : > { %v2126_v50 = vsel %vm3633_vm13, %v2124_v5, %v2125_v52 }
 0x1e2   : > { %2154 = vst [vmem:[%s3234_s7 + $0x34] sm:$0xf] %v2126_v50 }
 0x1e3   : > { %2792 = shalt.err (!%p2789_p6)
}
 0x1e4   : > { %s2793_s30 = scalar_lea.hbm %s3714_s19, 1152  ;;  %s2797_s29 = scalar_lea.hbm %s3775_s3, 2304 }
 0x1e5   : > { %p2794_p7 = scmp.ne.s32.totalorder %s3714_s19, %s2793_s30  ;;  %p2798_p0 = scmp.lt.u32.totalorder %s3714_s19, %s3775_s3 }
 0x1e6   : > { %p2799_p2 = scmp.lt.u32.totalorder %s2797_s29, %s2793_s30  ;;  %p2801_p8 = scmp.lt.u32.totalorder %s2793_s30, %s3714_s19 }
 0x1e7   : > { %p2795_p9 = pnand %p2794_p7, %p3837_p10 }
 0x1e8   : > { %p2800_p4 = por %p2799_p2, %p2798_p0 }
 0x1e9   : > { %p2796_p12 = pneg %p2795_p9 }
 0x1ea   : > { %p2802_p11 = por %p2801_p8, %p2800_p4 }
 0x1ec   : > { %p2803_p13 = pnand %p2802_p11, %p2796_p12 }
 0x1ee   : > { %2806 = shalt.err (!%p2803_p13)
}
 0x1ef   : > { %s2869_s9 = smov 4  }
 0x1f0   : > { %2585 = dma.vmem_to_hbm [thread:$0]  (%p3837_p10), %s3717_s11, 1152, %s3714_s19, %s3724_s21, %s2866_s26, %s2866_s26, %s2869_s9  }
 0x1f1 PF: > { %p2597_p1 = scmp.ge.s32.totalorder %s2861_s17, 2  ;;  %s2187_s10 = sand.u32 1, %s2841_s12  }
 0x1f2   : > { %p3838_p3 = scmp.ne.s32.totalorder %s3781_s24, 0  ;;  %s2188_s15 = scalar_lea.sflag [#allocation5], %s2187_s10 }
 0x1f4   : > { %p2592_p5 = pnand %p2597_p1, %p3838_p3 }
 0x1f6   : > { %2836 = dma.done.wait (!%p2592_p5), %s2188_s15, 1152  }
 0x1f7   : > { %2838 = vsyncadd (!%p2592_p5), %s2188_s15, 4294966144  ;;  %s17_s17 = sadd.s32 1, %s2861_s17   ;;  %s3839_s12 = smov %s2845_s13 }
 0x1f8   : > { %p14_p6 = scmp.ge.s32.totalorder %s17_s17, 4   ;;  %s3840_s13 = smov %s2849_s14 }
 0x1f9   : > { %s3841_s14 = smov %s2943_s25  ;;  %s3842_s15 = smov %s2857_s16 }
 0x1fa   : > { %s3843_s16 = smov %s3845_s20  ;;  %16 = sbr.rel (!%p14_p6) target bundleno = 5 (0x5), region = 76 }
 0x201   :  { %2193 = vsyncpa [#allocation4], 1 }
 0x202   :  { %2195 = vsyncpa [#allocation4 + $0x1], 1 }
 0x203   :  { %2196 = vsyncpa [#allocation5], 1 }
 0x204   :  { %2198 = vsyncpa [#allocation5 + $0x1], 1 }

</bundles_post_ra>
